<compile_context>
chip_gen: v6e
topology: v6e:2x2x1
jax: 0.10.0
libtpu: 0.0.40
codegen_flags: <defaults>
</compile_context>

<pallas_src>
import functools

import jax
import jax.numpy as jnp
from jax import lax
from jax.experimental import pallas as pl
from jax.experimental.pallas import tpu as pltpu


# ----------------------------------------------------------------------------
# Kernel
# ----------------------------------------------------------------------------
def kd_kernel(x_ref, tw_ref, tb_ref, fwt_ref, fb_ref, fcw_ref, fcb_ref,
              t_out_ref, s_out_ref, pooled_acc, feat_acc, *, inv_s, s_chunk):
    """Fused KD forward over one (b_blk, C, s_blk) tile.

    Grid = (B tiles, S tiles); S is the reduction axis.  Spatial sums are
    accumulated in VMEM scratch and the two classifier heads run once at the
    last S step.
    """
    s_idx = pl.program_id(1)

    @pl.when(s_idx == 0)
    def _init():
        pooled_acc[...] = jnp.zeros_like(pooled_acc)
        feat_acc[...] = jnp.zeros_like(feat_acc)

    b_blk, c_dim, s_blk = x_ref.shape
    f_pad = fwt_ref.shape[0]
    n_chunks = s_blk // s_chunk

    # Resident conv weight / bias, hoisted once per grid step (JAX does not
    # CSE broadcast_in_dim, so keep these out of the chunk loop).
    fw_b = jnp.broadcast_to(fwt_ref[...][None, :, :], (b_blk, f_pad, c_dim))  # bf16
    fb = fb_ref[...][None, :, :]                                              # (1, F_pad, 1) f32

    def accumulate(xc):
        # xc: (b_blk, C, s_chunk) float32.
        # Teacher branch: GAP numerator stays full f32 (matches f32 teacher).
        pooled_acc[...] += jnp.sum(xc, axis=2)
        # Student branch: 1x1 conv == batched (F_pad, C) @ (C, s_chunk) on the
        # MXU, bf16 operands, f32 accumulate; bias + ReLU on the VPU in f32.
        y = lax.dot_general(fw_b, xc.astype(jnp.bfloat16),
                            dimension_numbers=(((2,), (1,)), ((0,), (0,))),
                            preferred_element_type=jnp.float32)
        y = jnp.maximum(y + fb, 0.0)
        feat_acc[...] += jnp.sum(y, axis=2)

    if n_chunks == 1:
        accumulate(x_ref[...])
    else:
        # Bound the live f32 activation to (b_blk, F_pad, s_chunk) regardless
        # of how large the streamed DMA block is.
        @pl.loop(0, n_chunks, unroll=(n_chunks <= 4))
        def _chunks(ci):
            start = pl.multiple_of(ci * s_chunk, s_chunk)
            accumulate(x_ref[:, :, pl.ds(start, s_chunk)])

    @pl.when(s_idx == pl.num_programs(1) - 1)
    def _finalize():
        # Single 1/S scale, then the two tiny classifier heads (f32 MXU;
        # they run once per B tile, so kept f32 for fidelity).
        pooled = pooled_acc[...] * inv_s                                  # (b_blk, C)
        t_logits = (jnp.dot(pooled, tw_ref[...],
                            preferred_element_type=jnp.float32) + tb_ref[...])
        t_out_ref[...] = t_logits.reshape(t_out_ref.shape)
        feats = feat_acc[...] * inv_s                                     # (b_blk, F_pad)
        s_logits = (jnp.dot(feats, fcw_ref[...],
                            preferred_element_type=jnp.float32) + fcb_ref[...])
        s_out_ref[...] = s_logits.reshape(s_out_ref.shape)


# ----------------------------------------------------------------------------
# Tiling helpers
# ----------------------------------------------------------------------------
def _round_up(x, m):
    return ((x + m - 1) // m) * m


def _pick_batch_block(B, cap=64):
    """Largest divisor of B keeping >=2 batch tiles (v7x megacore) and <= cap."""
    if B <= 1:
        return max(B, 1)
    limit = max(1, min(cap, B // 2))
    best = 1
    for d in range(1, limit + 1):
        if B % d == 0:
            best = d
    return best


def _pick_spatial_block(S, bytes_per_s, budget_bytes):
    """Largest S block (multiple of 128 dividing S, or S itself) in budget."""
    cap = max(1, budget_bytes // max(1, bytes_per_s))
    if S <= cap:
        return S
    best = None
    d = 128
    while d <= min(S, cap):
        if S % d == 0:
            best = d
        d += 128
    return best if best is not None else S


def _pick_s_chunk(s_blk, max_chunk=512):
    for c in (max_chunk, 512, 256, 128):
        if c <= s_blk and s_blk % c == 0:
            return c
    return s_blk


def _vmem_limit_bytes():
    try:
        cap = int(pltpu.get_tpu_info().vmem_capacity_bytes)
    except Exception:
        cap = 64 * 1024 * 1024          # conservative default (v7x per-TC)
    # ~75% of physical VMEM: 48 MiB on v7x, ~96 MiB on v5e/v6e.
    return int(min(cap * 3 // 4, 100 * 1024 * 1024))


# ----------------------------------------------------------------------------
# Wrapper
# ----------------------------------------------------------------------------
def kd_forward(x_nchw, params, *, s_block=None, s_chunk=None):
    """x_nchw: [B, C, H, W] float32. Returns (teacher_output, student_output)."""
    B, C, H, W = x_nchw.shape
    S = H * W
    tw, tb, fw, fb, fcw, fcb = (params["tw"], params["tb"], params["fw"],
                                params["fb"], params["fcw"], params["fcb"])
    NC = tw.shape[1]
    F = fw.shape[1]
    NC_pad = _round_up(NC, 128)
    F_pad = _round_up(F, 128)

    # Native layout: NCHW -> (B, C, S) is a free reshape (no transpose, no
    # extra HBM pass).  x streams in f32; the student conv casts to bf16
    # inside the kernel for the MXU operand only.
    x = x_nchw.reshape(B, C, S)

    def pad2(a, rows, cols):
        return jnp.pad(a, ((0, rows - a.shape[0]), (0, cols - a.shape[1])))

    # Lane-dense, zero-padded parameters (pad columns stay zero through
    # bias/ReLU/heads; they are sliced off after the call).
    tw_p = pad2(tw, C, NC_pad)                                # (C, NC_pad) f32
    tb_p = pad2(tb, 1, NC_pad)                                # (1, NC_pad) f32
    fwt_p = pad2(fw, C, F_pad).T.astype(jnp.bfloat16)         # (F_pad, C) bf16
    fb_p = pad2(fb, 1, F_pad).T                               # (F_pad, 1) f32
    fcw_p = pad2(fcw, F_pad, NC_pad)                          # (F_pad, NC_pad) f32
    fcb_p = pad2(fcb, 1, NC_pad)                              # (1, NC_pad) f32

    b_blk = _pick_batch_block(B)

    # --- VMEM budget: counts lane/sublane padding and double buffering. ---
    vmem_limit = _vmem_limit_bytes()
    C8, C128, b8 = _round_up(C, 8), _round_up(C, 128), _round_up(b_blk, 8)
    s_chunk_cap = s_chunk if s_chunk is not None else 512
    resident = (C8 * NC_pad * 4 + 8 * NC_pad * 4              # tw, tb
                + F_pad * C128 * 2 + F_pad * 128 * 4          # fwT (bf16), fb
                + F_pad * NC_pad * 4 + 8 * NC_pad * 4)        # fcw, fcb
    accs = b8 * 128 * 4 + b8 * F_pad * 4                      # pooled_acc, feat_acc
    outs = 2 * 2 * b_blk * 8 * NC_pad * 4                     # 2 outputs x 2 buffers
    work = (b_blk * F_pad * s_chunk_cap * 4                   # f32 activation (one chunk)
            + b_blk * C8 * s_chunk_cap * 2                    # bf16 copy of the chunk
            + b_blk * F_pad * C128 * 2)                       # broadcast conv weight
    budget = max(vmem_limit - resident - accs - outs - work - (4 << 20), 1 << 20)
    bytes_per_s = 2 * b_blk * C8 * 4                          # double-buffered f32 x stream

    if s_block is not None:
        assert S % s_block == 0 and (s_block % 128 == 0 or s_block == S), s_block
        s_blk = s_block
    else:
        s_blk = _pick_spatial_block(S, bytes_per_s, budget)

    if s_chunk is None:
        s_chunk = _pick_s_chunk(s_blk)
    assert s_blk % s_chunk == 0, (s_blk, s_chunk)

    grid = (B // b_blk, S // s_blk)

    grid_spec = pltpu.PrefetchScalarGridSpec(
        num_scalar_prefetch=0,
        grid=grid,
        in_specs=[
            # Streamed activation block (double-buffered by Pallas), f32,
            # S on the 128-lane axis.
            pl.BlockSpec((b_blk, C, s_blk), lambda b, s: (b, 0, s)),
            # Parameters: constant index_map -> DMA'd once, VMEM-resident.
            pl.BlockSpec((C, NC_pad), lambda b, s: (0, 0)),
            pl.BlockSpec((1, NC_pad), lambda b, s: (0, 0)),
            pl.BlockSpec((F_pad, C), lambda b, s: (0, 0)),
            pl.BlockSpec((F_pad, 1), lambda b, s: (0, 0)),
            pl.BlockSpec((F_pad, NC_pad), lambda b, s: (0, 0)),
            pl.BlockSpec((1, NC_pad), lambda b, s: (0, 0)),
        ],
        out_specs=[
            # Same block across the S axis -> VMEM-resident until finalize.
            pl.BlockSpec((b_blk, 1, NC_pad), lambda b, s: (b, 0, 0)),
            pl.BlockSpec((b_blk, 1, NC_pad), lambda b, s: (b, 0, 0)),
        ],
        scratch_shapes=[
            pltpu.VMEM((b_blk, C), jnp.float32),      # teacher GAP numerator
            pltpu.VMEM((b_blk, F_pad), jnp.float32),  # student feature sum
        ],
    )

    t_pad, s_pad = pl.pallas_call(
        functools.partial(kd_kernel, inv_s=1.0 / float(S), s_chunk=s_chunk),
        out_shape=(
            jax.ShapeDtypeStruct((B, 1, NC_pad), jnp.float32),
            jax.ShapeDtypeStruct((B, 1, NC_pad), jnp.float32),
        ),
        grid_spec=grid_spec,
        compiler_params=pltpu.CompilerParams(
            # B tiles are independent (megacore split); S accumulates.
            dimension_semantics=("parallel", "arbitrary"),
            vmem_limit_bytes=vmem_limit,
        ),
    )(x, tw_p, tb_p, fwt_p, fb_p, fcw_p, fcb_p)

    return t_pad[:, 0, :NC], s_pad[:, 0, :NC]


# ----------------------------------------------------------------------------
# Pure-JAX reference (mirrors the kernel's student-path bf16 MXU operands)
# ----------------------------------------------------------------------------
def kd_reference(x_nchw, params):
    B, C, H, W = x_nchw.shape
    x = x_nchw.reshape(B, C, H * W).astype(jnp.float32)
    # Teacher: full f32 GAP + linear head.
    pooled = jnp.mean(x, axis=2)
    t_out = pooled @ params["tw"] + params["tb"]
    # Student: bf16 MXU operands, f32 accumulate (like the kernel).
    xb = x.astype(jnp.bfloat16).astype(jnp.float32)
    fwb = params["fw"].astype(jnp.bfloat16).astype(jnp.float32)   # (C, F)
    F = fwb.shape[1]
    y = jnp.einsum("bcs,cf->bfs", xb, fwb) + params["fb"].reshape(1, F, 1)
    y = jnp.maximum(y, 0.0)
    feats = jnp.mean(y, axis=2)
    s_out = feats @ params["fcw"] + params["fcb"]
    return t_out, s_out


def init_params(key, C, F, NC):
    k1, k2, k3 = jax.random.split(key, 3)
    scale = 0.1
    return {
        # teacher linear head: (C -> NC)
        "tw": scale * jax.random.normal(k1, (C, NC), jnp.float32),
        "tb": jnp.zeros((1, NC), jnp.float32),
        # student 1x1-conv feature extractor: (C -> F)
        "fw": scale * jax.random.normal(k2, (C, F), jnp.float32),
        "fb": jnp.zeros((1, F), jnp.float32),
        # student_fc: (F -> NC)
        "fcw": scale * jax.random.normal(k3, (F, NC), jnp.float32),
        "fcb": jnp.zeros((1, NC), jnp.float32),
    }


if __name__ == "__main__":
    B, C, H, W = 2, 4, 16, 16      # small NCHW input
    F = 64                         # stand-in for resnet50 feature_dim (2048)
    NC = 10                        # num_classes

    key = jax.random.PRNGKey(0)
    kx, kp = jax.random.split(key)
    x = jax.random.normal(kx, (B, C, H, W), jnp.float32)
    params = init_params(kp, C, F, NC)

    t_ref, s_ref = kd_reference(x, params)

    # 1) auto-sized blocks (single spatial step at this toy size)
    t_out, s_out = kd_forward(x, params)
    jax.block_until_ready((t_out, s_out))
    assert t_out.shape == (B, NC) and s_out.shape == (B, NC)
    assert jnp.allclose(t_out, t_ref, atol=3e-3, rtol=3e-3)
    assert jnp.allclose(s_out, s_ref, atol=3e-3, rtol=3e-3)

    # 2) multi-step spatial reduction across the grid (VMEM accumulator path)
    t2, s2 = kd_forward(x, params, s_block=128)
    jax.block_until_ready((t2, s2))
    assert jnp.allclose(t2, t_ref, atol=3e-3, rtol=3e-3)
    assert jnp.allclose(s2, s_ref, atol=3e-3, rtol=3e-3)

    # 3) inner spatial-chunk loop inside one grid step (bounded f32 activation)
    t3, s3 = kd_forward(x, params, s_block=256, s_chunk=128)
    jax.block_until_ready((t3, s3))
    assert jnp.allclose(t3, t_ref, atol=3e-3, rtol=3e-3)
    assert jnp.allclose(s3, s_ref, atol=3e-3, rtol=3e-3)

    print("KERNEL_OK")
</pallas_src>

<mosaic_0001>
module attributes {stable_mosaic.version = 11 : i64} {
  func.func @kd_kernel(%arg0: i32, %arg1: i32, %arg2: memref<1x4x256xf32, #tpu.memory_space<vmem>>, %arg3: memref<4x128xf32, #tpu.memory_space<vmem>>, %arg4: memref<1x128xf32, #tpu.memory_space<vmem>>, %arg5: memref<128x4xbf16, #tpu.memory_space<vmem>>, %arg6: memref<128x1xf32, #tpu.memory_space<vmem>>, %arg7: memref<128x128xf32, #tpu.memory_space<vmem>>, %arg8: memref<1x128xf32, #tpu.memory_space<vmem>>, %arg9: memref<1x1x128xf32, #tpu.memory_space<vmem>>, %arg10: memref<1x1x128xf32, #tpu.memory_space<vmem>>, %arg11: memref<1x4xf32, #tpu.memory_space<vmem>>, %arg12: memref<1x128xf32, #tpu.memory_space<vmem>>) attributes {dimension_semantics = [#tpu.dimension_semantics<parallel>, #tpu.dimension_semantics<arbitrary>], iteration_bounds = array<i64: 2, 1>, scalar_prefetch = 0 : i64, scratch_operands = 2 : i64, tpu.core_type = #tpu.core_type<tc>, window_params = [{transform_indices = @transform_0, window_bounds = array<i64: 1, 4, 256>}, {pipeline_mode = #tpu.pipeline_mode<synchronous>, transform_indices = @transform_1, window_bounds = array<i64: 4, 128>}, {pipeline_mode = #tpu.pipeline_mode<synchronous>, transform_indices = @transform_2, window_bounds = array<i64: 1, 128>}, {pipeline_mode = #tpu.pipeline_mode<synchronous>, transform_indices = @transform_3, window_bounds = array<i64: 128, 4>}, {pipeline_mode = #tpu.pipeline_mode<synchronous>, transform_indices = @transform_4, window_bounds = array<i64: 128, 1>}, {pipeline_mode = #tpu.pipeline_mode<synchronous>, transform_indices = @transform_5, window_bounds = array<i64: 128, 128>}, {pipeline_mode = #tpu.pipeline_mode<synchronous>, transform_indices = @transform_6, window_bounds = array<i64: 1, 128>}, {transform_indices = @transform_7, window_bounds = array<i64: 1, 1, 128>}, {transform_indices = @transform_8, window_bounds = array<i64: 1, 1, 128>}]} {
    %c0_i32 = arith.constant 0 : i32
    %0 = arith.cmpi eq, %arg1, %c0_i32 : i32
    %1 = arith.extui %0 : i1 to i32
    %c0_i32_0 = arith.constant 0 : i32
    %2 = arith.cmpi ne, %1, %c0_i32_0 : i32
    scf.if %2 {
      %cst_20 = arith.constant 0.000000e+00 : f32
      %25 = vector.broadcast %cst_20 : f32 to vector<1x4xf32>
      %c0_21 = arith.constant 0 : index
      %c0_22 = arith.constant 0 : index
      %26 = vector.load %arg11[%c0_21, %c0_22] : memref<1x4xf32, #tpu.memory_space<vmem>>, vector<1x4xf32>
      tpu.vector_store %arg11[%c0_21, %c0_22], %25 {strides = array<i32>} : memref<1x4xf32, #tpu.memory_space<vmem>>, vector<1x4xf32>,
      %cst_23 = arith.constant 0.000000e+00 : f32
      %27 = vector.broadcast %cst_23 : f32 to vector<1x128xf32>
      %c0_24 = arith.constant 0 : index
      %c0_25 = arith.constant 0 : index
      %28 = vector.load %arg12[%c0_24, %c0_25] : memref<1x128xf32, #tpu.memory_space<vmem>>, vector<1x128xf32>
      tpu.vector_store %arg12[%c0_24, %c0_25], %27 {strides = array<i32>} : memref<1x128xf32, #tpu.memory_space<vmem>>, vector<1x128xf32>,
    } else {
    }
    %c0 = arith.constant 0 : index
    %c0_1 = arith.constant 0 : index
    %3 = vector.load %arg5[%c0, %c0_1] : memref<128x4xbf16, #tpu.memory_space<vmem>>, vector<128x4xbf16>
    %4 = vector.shape_cast %3 : vector<128x4xbf16> to vector<1x128x4xbf16>
    %c0_2 = arith.constant 0 : index
    %c0_3 = arith.constant 0 : index
    %5 = vector.load %arg6[%c0_2, %c0_3] : memref<128x1xf32, #tpu.memory_space<vmem>>, vector<128x1xf32>
    %6 = vector.shape_cast %5 : vector<128x1xf32> to vector<1x128x1xf32>
    %c0_4 = arith.constant 0 : index
    %c0_5 = arith.constant 0 : index
    %c0_6 = arith.constant 0 : index
    %7 = vector.load %arg2[%c0_4, %c0_5, %c0_6] : memref<1x4x256xf32, #tpu.memory_space<vmem>>, vector<1x4x256xf32>
    %c0_7 = arith.constant 0 : index
    %c0_8 = arith.constant 0 : index
    %8 = vector.load %arg11[%c0_7, %c0_8] : memref<1x4xf32, #tpu.memory_space<vmem>>, vector<1x4xf32>
    %cst = arith.constant dense<0.000000e+00> : vector<1x4xf32>
    %9 = vector.multi_reduction <add>, %7, %cst [2] : vector<1x4x256xf32> to vector<1x4xf32>
    %10 = arith.addf %8, %9 : vector<1x4xf32>
    %c0_9 = arith.constant 0 : index
    %c0_10 = arith.constant 0 : index
    %11 = vector.load %arg11[%c0_9, %c0_10] : memref<1x4xf32, #tpu.memory_space<vmem>>, vector<1x4xf32>
    tpu.vector_store %arg11[%c0_9, %c0_10], %10 {strides = array<i32>} : memref<1x4xf32, #tpu.memory_space<vmem>>, vector<1x4xf32>,
    %12 = arith.truncf %7 : vector<1x4x256xf32> to vector<1x4x256xbf16>
    %cst_11 = arith.constant dense<0.000000e+00> : vector<1x128x256xf32>
    %13 = tpu.matmul %4, %12, %cst_11 {dimension_numbers = #tpu.dot_dimension_numbers<[2], [1], [1], [2], [0, 0, 0, 1, 1, 2], [0], [0]>} : vector<1x128x4xbf16>, vector<1x4x256xbf16>, vector<1x128x256xf32> -> vector<1x128x256xf32>
    %14 = vector.broadcast %6 : vector<1x128x1xf32> to vector<1x128x256xf32>
    %15 = arith.addf %13, %14 : vector<1x128x256xf32>
    %cst_12 = arith.constant 0.000000e+00 : f32
    %16 = vector.broadcast %cst_12 : f32 to vector<1x128x256xf32>
    %17 = arith.maximumf %15, %16 : vector<1x128x256xf32>
    %c0_13 = arith.constant 0 : index
    %c0_14 = arith.constant 0 : index
    %18 = vector.load %arg12[%c0_13, %c0_14] : memref<1x128xf32, #tpu.memory_space<vmem>>, vector<1x128xf32>
    %cst_15 = arith.constant dense<0.000000e+00> : vector<1x128xf32>
    %19 = vector.multi_reduction <add>, %17, %cst_15 [2] : vector<1x128x256xf32> to vector<1x128xf32>
    %20 = arith.addf %18, %19 : vector<1x128xf32>
    %c0_16 = arith.constant 0 : index
    %c0_17 = arith.constant 0 : index
    %21 = vector.load %arg12[%c0_16, %c0_17] : memref<1x128xf32, #tpu.memory_space<vmem>>, vector<1x128xf32>
    tpu.vector_store %arg12[%c0_16, %c0_17], %20 {strides = array<i32>} : memref<1x128xf32, #tpu.memory_space<vmem>>, vector<1x128xf32>,
    %c0_i32_18 = arith.constant 0 : i32
    %22 = arith.cmpi eq, %arg1, %c0_i32_18 : i32
    %23 = arith.extui %22 : i1 to i32
    %c0_i32_19 = arith.constant 0 : i32
    %24 = arith.cmpi ne, %23, %c0_i32_19 : i32
    scf.if %24 {
      %c0_20 = arith.constant 0 : index
      %c0_21 = arith.constant 0 : index
      %25 = vector.load %arg11[%c0_20, %c0_21] : memref<1x4xf32, #tpu.memory_space<vmem>>, vector<1x4xf32>
      %cst_22 = arith.constant 3.906250e-03 : f32
      %26 = vector.broadcast %cst_22 : f32 to vector<1x4xf32>
      %27 = arith.mulf %25, %26 : vector<1x4xf32>
      %c0_23 = arith.constant 0 : index
      %c0_24 = arith.constant 0 : index
      %28 = vector.load %arg3[%c0_23, %c0_24] : memref<4x128xf32, #tpu.memory_space<vmem>>, vector<4x128xf32>
      %cst_25 = arith.constant dense<0.000000e+00> : vector<1x128xf32>
      %29 = tpu.matmul %27, %28, %cst_25 {dimension_numbers = #tpu.dot_dimension_numbers<[1], [0], [0], [1], [0, 0, 1, 1], [], []>} : vector<1x4xf32>, vector<4x128xf32>, vector<1x128xf32> -> vector<1x128xf32>
      %c0_26 = arith.constant 0 : index
      %c0_27 = arith.constant 0 : index
      %30 = vector.load %arg4[%c0_26, %c0_27] : memref<1x128xf32, #tpu.memory_space<vmem>>, vector<1x128xf32>
      %31 = arith.addf %29, %30 : vector<1x128xf32>
      %32 = vector.shape_cast %31 : vector<1x128xf32> to vector<1x1x128xf32>
      %c0_28 = arith.constant 0 : index
      %c0_29 = arith.constant 0 : index
      %c0_30 = arith.constant 0 : index
      %33 = vector.load %arg9[%c0_28, %c0_29, %c0_30] : memref<1x1x128xf32, #tpu.memory_space<vmem>>, vector<1x1x128xf32>
      tpu.vector_store %arg9[%c0_28, %c0_29, %c0_30], %32 {strides = array<i32>} : memref<1x1x128xf32, #tpu.memory_space<vmem>>, vector<1x1x128xf32>,
      %c0_31 = arith.constant 0 : index
      %c0_32 = arith.constant 0 : index
      %34 = vector.load %arg12[%c0_31, %c0_32] : memref<1x128xf32, #tpu.memory_space<vmem>>, vector<1x128xf32>
      %cst_33 = arith.constant 3.906250e-03 : f32
      %35 = vector.broadcast %cst_33 : f32 to vector<1x128xf32>
      %36 = arith.mulf %34, %35 : vector<1x128xf32>
      %c0_34 = arith.constant 0 : index
      %c0_35 = arith.constant 0 : index
      %37 = vector.load %arg7[%c0_34, %c0_35] : memref<128x128xf32, #tpu.memory_space<vmem>>, vector<128x128xf32>
      %cst_36 = arith.constant dense<0.000000e+00> : vector<1x128xf32>
      %38 = tpu.matmul %36, %37, %cst_36 {dimension_numbers = #tpu.dot_dimension_numbers<[1], [0], [0], [1], [0, 0, 1, 1], [], []>} : vector<1x128xf32>, vector<128x128xf32>, vector<1x128xf32> -> vector<1x128xf32>
      %c0_37 = arith.constant 0 : index
      %c0_38 = arith.constant 0 : index
      %39 = vector.load %arg8[%c0_37, %c0_38] : memref<1x128xf32, #tpu.memory_space<vmem>>, vector<1x128xf32>
      %40 = arith.addf %38, %39 : vector<1x128xf32>
      %41 = vector.shape_cast %40 : vector<1x128xf32> to vector<1x1x128xf32>
      %c0_39 = arith.constant 0 : index
      %c0_40 = arith.constant 0 : index
      %c0_41 = arith.constant 0 : index
      %42 = vector.load %arg10[%c0_39, %c0_40, %c0_41] : memref<1x1x128xf32, #tpu.memory_space<vmem>>, vector<1x1x128xf32>
      tpu.vector_store %arg10[%c0_39, %c0_40, %c0_41], %41 {strides = array<i32>} : memref<1x1x128xf32, #tpu.memory_space<vmem>>, vector<1x1x128xf32>,
    } else {
    }
    return
  }
  func.func @transform_0(%arg0: i32, %arg1: i32) -> (i32, i32, i32) {
    %c0_i32 = arith.constant 0 : i32
    %c0_i32_0 = arith.constant 0 : i32
    return %arg0, %c0_i32, %arg1 : i32, i32, i32
  }
  func.func @transform_1(%arg0: i32, %arg1: i32) -> (i32, i32) {
    %c0_i32 = arith.constant 0 : i32
    %c0_i32_0 = arith.constant 0 : i32
    %c0_i32_1 = arith.constant 0 : i32
    return %c0_i32, %c0_i32_0 : i32, i32
  }
  func.func @transform_2(%arg0: i32, %arg1: i32) -> (i32, i32) {
    %c0_i32 = arith.constant 0 : i32
    %c0_i32_0 = arith.constant 0 : i32
    %c0_i32_1 = arith.constant 0 : i32
    return %c0_i32, %c0_i32_0 : i32, i32
  }
  func.func @transform_3(%arg0: i32, %arg1: i32) -> (i32, i32) {
    %c0_i32 = arith.constant 0 : i32
    %c0_i32_0 = arith.constant 0 : i32
    %c0_i32_1 = arith.constant 0 : i32
    return %c0_i32, %c0_i32_0 : i32, i32
  }
  func.func @transform_4(%arg0: i32, %arg1: i32) -> (i32, i32) {
    %c0_i32 = arith.constant 0 : i32
    %c0_i32_0 = arith.constant 0 : i32
    %c0_i32_1 = arith.constant 0 : i32
    return %c0_i32, %c0_i32_0 : i32, i32
  }
  func.func @transform_5(%arg0: i32, %arg1: i32) -> (i32, i32) {
    %c0_i32 = arith.constant 0 : i32
    %c0_i32_0 = arith.constant 0 : i32
    %c0_i32_1 = arith.constant 0 : i32
    return %c0_i32, %c0_i32_0 : i32, i32
  }
  func.func @transform_6(%arg0: i32, %arg1: i32) -> (i32, i32) {
    %c0_i32 = arith.constant 0 : i32
    %c0_i32_0 = arith.constant 0 : i32
    %c0_i32_1 = arith.constant 0 : i32
    return %c0_i32, %c0_i32_0 : i32, i32
  }
  func.func @transform_7(%arg0: i32, %arg1: i32) -> (i32, i32, i32) {
    %c0_i32 = arith.constant 0 : i32
    %c0_i32_0 = arith.constant 0 : i32
    %c0_i32_1 = arith.constant 0 : i32
    return %arg0, %c0_i32, %c0_i32_0 : i32, i32, i32
  }
  func.func @transform_8(%arg0: i32, %arg1: i32) -> (i32, i32, i32) {
    %c0_i32 = arith.constant 0 : i32
    %c0_i32_0 = arith.constant 0 : i32
    %c0_i32_1 = arith.constant 0 : i32
    return %arg0, %c0_i32, %c0_i32_0 : i32, i32, i32
  }
}

</mosaic_0001>

<bundles_post_ra>
// kernel: tpu_custom_call.1
= control target key start
LH: loop header
LB: loop body
LE: loop exit
PB: predicated region body
PF: predicated region fallthrough
CT: control target
= control target key end

     0   :  { %s3570_s0 = inlined_call_operand.vmem [shape: f32[2,4,256], index: 0, kind: input, shape index: {}]   ;;  %s3571_s1 = inlined_call_operand.vmem [shape: f32[4,128], index: 1, kind: input, shape index: {}]   ;;  %s3572_s2 = inlined_call_operand.vmem [shape: f32[1,128], index: 2, kind: input, shape index: {}]   ;;  %s3573_s3 = inlined_call_operand.vmem [shape: bf16[128,4], index: 3, kind: input, shape index: {}]   ;;  %s3574_s4 = inlined_call_operand.vmem [shape: f32[128,1], index: 4, kind: input, shape index: {}]   ;;  %s3575_s5 = inlined_call_operand.vmem [shape: f32[128,128], index: 5, kind: input, shape index: {}]   ;;  %s3576_s6 = inlined_call_operand.vmem [shape: f32[1,128], index: 6, kind: input, shape index: {}]   ;;  %s3577_s7 = inlined_call_operand.hbm [shape: f32[2,1,128], index: 7, kind: output, shape index: {0}]   ;;  %s3578_s8 = inlined_call_operand.hbm [shape: f32[2,1,128], index: 8, kind: output, shape index: {1}]  }
   0x1   :  { %3580 = sst [smem:[#allocation10_spill]] %s3570_s0 }
   0x2   :  { %3581 = sst [smem:[#allocation11_spill]] %s3571_s1 }
   0x3   :  { %14 = vsyncpa [#allocation5], 0 }
   0x4   :  { %16 = vsyncpa [#allocation5 + $0x1], 0 }
   0x5   :  { %17 = vsyncpa [#allocation7], 0 }
   0x6   :  { %19 = vsyncpa [#allocation7 + $0x1], 0  ;;  %s2921_s27 = smov 0   ;;  %s2923_s28 = smov 0  }
   0x7   :  { %s2925_s29 = smov 0   ;;  %s2927_s30 = smov 0  }
   0x8   :  { %s2929_s9 = smov 0   ;;  %s2931_s10 = smov 0  }
   0x9 LB: > { %s2595_s11 = sadd.s32 4294967295, %s2868_s10   ;;  %s2596_s12 = sadd.s32 4294967294, %s2868_s10   ;;  %s2868_s10 = sphi %s2931_s10, %s25_s10   ;;  %s2864_s9 = sphi %s2929_s9, %s3591_s9   ;;  %s2860_s30 = sphi %s2927_s30, %s3590_s30   ;;  %s2856_s29 = sphi %s2925_s29, %s3589_s29   ;;  %s2852_s28 = sphi %s2923_s28, %s3588_s28   ;;  %s2848_s27 = sphi %s2921_s27, %s3587_s27  }
   0xa   : > { %s37_s13 = sadd.s32 1, %s2864_s9  ;;  %s198_s14 = sadd.s32 1, %s2856_s29 }
   0xb   : > { %p39_p0 = scmp.ge.s32.totalorder %s37_s13, 2  ;;  %p208_p1 = scmp.ne.s32.totalorder %s2856_s29, %s2852_s28 }
   0xc   : > { %p209_p2 = scmp.eq.s32.totalorder %s2595_s11, 1  ;;  %p214_p3 = scmp.ne.s32.totalorder %s2852_s28, %s2848_s27 }
   0xd   : > { %s3593_s13 = smov (%p39_p0, %s37_s13), 0  ;;  %p215_p5 = scmp.eq.s32.totalorder %s2596_s12, 1 }
   0xe   : > { %p2961_p4 = por %p209_p2, %p208_p1  ;;  %s195_s16 = ssub.s32 %s2864_s9, %s3593_s13 }
   0xf   : > { %p2599_p6 = scmp.ge.s32.totalorder %s2868_s10, 1  ;;  %p196_p7 = scmp.eq.s32.totalorder %s195_s16, 0 }
  0x10   : > { %p2968_p8 = por %p215_p5, %p214_p3  ;;  %p290_p9 = scmp.lt.s32.totalorder %s2868_s10, 3 }
  0x11   : > { %s2974_s18 = scalar_select %p196_p7, %s2856_s29, %s198_s14  }
  0x12   : > { %p291_p10 = pnand %p2599_p6, %p290_p9 }
  0x13   : > { %p332_p11 = scmp.lt.s32.totalorder (!%p291_p10), %s2860_s30, 1  ;;  %s3584_s0 = sld [smem:[#allocation10_spill]] (!%p291_p10) }
  0x14   : > { %294 = sbr.rel (%p291_p10) target bundleno = 821 (0x335), region = 48  ;;  %s3585_s1 = sld [smem:[#allocation11_spill]] (!%p291_p10) }
  0x15   : > { %s3495_s22 = sand.u32 (!%p291_p10), 1, %s2852_s28   ;;  %s3579_s26 = sshll.u32 (!%p291_p10), %s2860_s30, 4 }
  0x16   : > { %s324_s25 = scalar_lea.vmem (!%p291_p10), [#allocation4], %s3495_s22  ;;  %s2483_s16 = scalar_lea.hbm (!%p291_p10), %s3577_s7, %s3579_s26 }
  0x17   : > { %s2485_s11 = sshll.u32 (!%p291_p10), %s324_s25, 4  ;;  %s2874_s21 = smov (!%p291_p10), [#allocation4]   ;;  %s2486_s11 = int_to_ptr.vmem [resolvable:$true] %s2485_s11 }
  0x19   : > { %v2870_v0 = vmov 0   ;;  %s333_s19 = scalar_select %p332_p11, %s2860_s30, 1  ;;  %vm607_vm0 = vcmask 1041408   ;;  %v365_v4 = vld [vmem:[%s3574_s4] sm:$0xff]  ;;  %v367_v7 = vld [vmem:[%s3574_s4 + $0x10] sm:$0xff]  ;;  %v366_v8 = vld [vmem:[%s3574_s4 + $0x8] sm:$0xff] }
  0x1a   : > { %646 = vmatprep.mubr.bf16.mxu0 %v2870_v0  ;;  %716 = vmatprep.mubr.bf16.mxu1 %v2870_v0  ;;  %v2754_v9 = vld [vmem:[%s3573_s3] sm:$0xff]   ;;  %v2757_v10 = vld [vmem:[%s3573_s3 + $0x38] sm:$0xff]   ;;  %vm582_vm1 = vcmask 31744   ;;  %v370_v13 = vld [vmem:[%s3574_s4 + $0x28] sm:$0xff]  ;;  %vm386_vm2 = vcmask 1043456   ;;  %vm346_vm3 = vcmask 24576  }
  0x1b   : > { %2751 = vset.pattern.permute.xlu0 %v2870_v0  ;;  %2752 = vset.pattern.permute.xlu1 %v2870_v0  ;;  %s2625_s20 = sshll.u32 %s333_s19, 3  ;;  %v368_v11 = vld [vmem:[%s3574_s4 + $0x18] sm:$0xff]  ;;  %v369_v12 = vld [vmem:[%s3574_s4 + $0x20] sm:$0xff]  ;;  %v371_v14 = vld [vmem:[%s3574_s4 + $0x30] sm:$0xff]  ;;  %vm2873_vm4 = vmmov 0   ;;  %vm2177_vm5 = vcmask 130112  }
  0x1c   : > { %s339_s23 = scalar_lea.vmem %s3584_s0, %s2625_s20  ;;  %464 = vperm.xlu0 %2751, %v365_v4   ;;  %474 = vperm.xlu1 %2752, %v367_v7   ;;  %v2755_v15 = vld [vmem:[%s3573_s3 + $0x8] sm:$0xff]   ;;  %v372_v16 = vld [vmem:[%s3574_s4 + $0x38] sm:$0xff]  ;;  %v373_v17 = vld [vmem:[%s3574_s4 + $0x40] sm:$0xff]  ;;  %vm2184_vm6 = vcmask 195712   ;;  %vm2191_vm7 = vcmask 261312   ;;  %vm2198_vm8 = vcmask 326912  }
  0x1d   : > { %v2985_v1 = vld [vmem:[%s339_s23] sm:$0xff]  ;;  %v374_v18 = vld [vmem:[%s3574_s4 + $0x48] sm:$0xff]  ;;  %v375_v19 = vld [vmem:[%s3574_s4 + $0x50] sm:$0xff]  ;;  %vm2205_vm9 = vcmask 392512   ;;  %vm2212_vm10 = vcmask 458112   ;;  %vm2219_vm11 = vcmask 523712  }
  0x1e   : > { %v2989_v2 = vcombine.high %v2985_v1, %v2985_v1  ;;  %v460_v3 = vpack.c.bf16 %v2985_v1, %v2985_v1  ;;  %v2756_v20 = vld [vmem:[%s3573_s3 + $0x10] sm:$0xff]   ;;  %v376_v21 = vld [vmem:[%s3574_s4 + $0x58] sm:$0xff]  ;;  %v377_v22 = vld [vmem:[%s3574_s4 + $0x60] sm:$0xff]  ;;  %v387_v30 = vsel %vm386_vm2, %v2985_v1, 0.0  ;;  %vm2226_vm12 = vcmask 589312   ;;  %s2469_s19 = scalar_lea.sflag [#allocation5], %s3495_s22 }
  0x1f   : > { %v378_v23 = vld [vmem:[%s3574_s4 + $0x68] sm:$0xff]  ;;  %v379_v24 = vld [vmem:[%s3574_s4 + $0x70] sm:$0xff]  ;;  %v2758_v25 = vld [vmem:[%s3573_s3 + $0x18] sm:$0xff]   ;;  %vm2233_vm13 = vcmask 654912   ;;  %vm2240_vm14 = vcmask 720512   ;;  %vm2247_vm15 = vcmask 786112  }
  0x20   : > { %v461_v5 = vpack.c.bf16 %v2989_v2, %v2989_v2  ;;  %v609_v6 = vsel %vm607_vm0, %v460_v3, 0  ;;  %469 = vperm.xlu0 %2751, %v366_v8   ;;  %479 = vperm.xlu1 %2752, %v368_v11   ;;  %v380_v26 = vld [vmem:[%s3574_s4 + $0x78] sm:$0xff]  ;;  %v2759_v27 = vld [vmem:[%s3573_s3 + $0x20] sm:$0xff]   ;;  %v2760_v28 = vld [vmem:[%s3573_s3 + $0x28] sm:$0xff]   ;;  %v388_v31 = vsel %vm386_vm2, %v2989_v2, 0.0  ;;  %s2762_s20 = scalar_lea.vmem %s2486_s11, 16 }
  0x21   : > { %v2761_v29 = vld [vmem:[%s3573_s3 + $0x30] sm:$0xff]   ;;  %v389_v32 = vadd.f32 %v388_v31, %v387_v30  ;;  %p2763_p12 = scmp.ne.s32.totalorder %s2486_s11, %s2762_s20  ;;  %s2766_s23 = sshll.u32 %s2874_s21, 4  ;;  %s2767_s23 = int_to_ptr.vmem [resolvable:$false] %s2766_s23 }
  0x22   : > { %2610 = vmatprep.subr.msk.bf16.mxu0 %vm607_vm0, %v461_v5  ;;  %2685 = vmatprep.subr.msk.bf16.mxu1 %vm607_vm0, %v461_v5  ;;  %vm2254_vm0 = vcmask 851712   ;;  %s2768_s24 = scalar_lea.vmem %s2767_s23, 32  ;;  %p2769_p1 = scmp.lt.s32.totalorder %s2486_s11, %s2767_s23 }
  0x23   : > { %629 = vmatpush1.bf16.msra.mxu0 %v609_v6  ;;  %2686 = vmatpush1.bf16.msra.mxu1 %v609_v6  ;;  %p2764_p13 = pnand %p2763_p12, %p2961_p4  ;;  %p2770_p2 = scmp.lt.s32.totalorder %s2768_s24, %s2762_s20 }
  0x24   : > { %484 = vperm.xlu0 %2751, %v369_v12   ;;  %489 = vperm.xlu1 %2752, %v370_v13  }
  0x25   : > { %p2765_p0 = pneg %p2764_p13  ;;  %p2771_p3 = por %p2770_p2, %p2769_p1 }
  0x26   : > { %2611 = vmatmul.mubr.msk.bf16.vlgmr.msra.gmra.mxu0 %vm582_vm1, %v2754_v9  ;;  %2618 = vmatmul.mubr.msk.bf16.vlgmr.msra.gmra.mxu1 %vm582_vm1, %v2757_v10 }
  0x27   : > { %656 = vmatprep.mubr.bf16.mxu0 %v2870_v0  ;;  %p2772_p5 = pnand %p2771_p3, %p2765_p0 }
  0x28   : > { %494 = vperm.xlu0 %2751, %v371_v14   ;;  %499 = vperm.xlu1 %2752, %v372_v16  }
  0x2c   : > { %504 = vperm.xlu0 %2751, %v373_v17   ;;  %509 = vperm.xlu1 %2752, %v374_v18  }
  0x2e   : > { %2612 = vmatmul.mubr.msk.bf16.gmra.mxu0 %vm582_vm1, %v2755_v15 }
  0x2f   : > { %666 = vmatprep.mubr.bf16.mxu0 %v2870_v0 }
  0x30   : > { %514 = vperm.xlu0 %2751, %v375_v19   ;;  %519 = vperm.xlu1 %2752, %v376_v21  }
  0x34   : > { %524 = vperm.xlu0 %2751, %v377_v22   ;;  %529 = vperm.xlu1 %2752, %v378_v23  }
  0x36   : > { %2613 = vmatmul.mubr.msk.bf16.gmra.mxu0 %vm582_vm1, %v2756_v20 }
  0x37   : > { %676 = vmatprep.mubr.bf16.mxu0 %v2870_v0 }
  0x38   : > { %534 = vperm.xlu0 %2751, %v379_v24   ;;  %539 = vperm.xlu1 %2752, %v380_v26  }
  0x3e   : > { %2614 = vmatmul.mubr.msk.bf16.gmra.mxu0 %vm582_vm1, %v2758_v25 }
  0x3f   : > { %686 = vmatprep.mubr.bf16.mxu0 %v2870_v0 }
  0x46   : > { %2615 = vmatmul.mubr.msk.bf16.gmra.mxu0 %vm582_vm1, %v2759_v27 }
  0x47   : > { %696 = vmatprep.mubr.bf16.mxu0 %v2870_v0 }
  0x4e   : > { %2616 = vmatmul.mubr.msk.bf16.gmra.mxu0 %vm582_vm1, %v2760_v28 }
  0x4f   : > { %706 = vmatprep.mubr.bf16.mxu0 %v2870_v0 }
  0x56   : > { %2617 = vmatmul.mubr.msk.bf16.gmra.mxu0 %vm582_vm1, %v2761_v29 }
  0x57   : > { %390 = vadd.xlane.f32.xlu0 %v389_v32 }
  0x97   : > { %v465_v33 = vpop.permute.xlu0 %464  ;;  %v475_v43 = vpop.permute.xlu1 %474 }
  0x9b   : > { %v470_v38 = vpop.permute.xlu0 %469  ;;  %v480_v54 = vpop.permute.xlu1 %479 }
  0x9f   : > { %v485_v62 = vpop.permute.xlu0 %484  ;;  %v490_v6 = vpop.permute.xlu1 %489 }
  0xa3   : > { %v495_v12 = vpop.permute.xlu0 %494  ;;  %v500_v20 = vpop.permute.xlu1 %499 }
  0xa7   : > { %v505_v24 = vpop.permute.xlu0 %504  ;;  %v510_v32 = vpop.permute.xlu1 %509 }
  0xe6   : > { %v648_v34 = vpop.f32.mrf.mxu0 }
  0xe7   : > { %v649_v35 = vadd.f32 %v648_v34, %v465_v33 }
  0xe8   : > { %v650_v36 = vpop.f32.mrf.mxu0 }
  0xe9   : > { %v651_v37 = vadd.f32 %v650_v36, %v465_v33  ;;  %v727_v40 = vmax.f32 %v649_v35, 0.0 }
  0xea   : > { %v652_v39 = vpop.f32.mrf.mxu0 }
  0xeb   : > { %v728_v41 = vmax.f32 %v651_v37, 0.0  ;;  %v653_v42 = vadd.f32 %v652_v39, %v470_v38  ;;  %v515_v37 = vpop.permute.xlu0 %514 }
  0xec   : > { %v654_v44 = vpop.f32.mrf.mxu0 }
  0xed   : > { %v655_v45 = vadd.f32 %v654_v44, %v470_v38  ;;  %v760_v46 = vadd.f32 %v728_v41, %v727_v40  ;;  %v729_v48 = vmax.f32 %v653_v42, 0.0 }
  0xee   : > { %v658_v47 = vpop.f32.mrf.mxu0 }
  0xef   : > { %v730_v49 = vmax.f32 %v655_v45, 0.0  ;;  %v659_v50 = vadd.f32 %v658_v47, %v475_v43  ;;  %761 = vadd.xlane.f32.xlu1 %v760_v46  ;;  %v520_v45 = vpop.permute.xlu1 %519 }
  0xf0   : > { %v660_v51 = vpop.f32.mrf.mxu0 }
  0xf1   : > { %v661_v52 = vadd.f32 %v660_v51, %v475_v43  ;;  %v763_v53 = vadd.f32 %v730_v49, %v729_v48  ;;  %v731_v56 = vmax.f32 %v659_v50, 0.0  ;;  %v718_v48 = vpop.f32.mrf.mxu1  ;;  %v525_v50 = vpop.permute.xlu0 %524 }
  0xf2   : > { %v662_v55 = vpop.f32.mrf.mxu0 }
  0xf3   : > { %v732_v57 = vmax.f32 %v661_v52, 0.0  ;;  %v663_v58 = vadd.f32 %v662_v55, %v480_v54  ;;  %764 = vadd.xlane.f32.xlu0 %v763_v53 }
  0xf4   : > { %v664_v59 = vpop.f32.mrf.mxu0 }
  0xf5   : > { %v665_v60 = vadd.f32 %v664_v59, %v480_v54  ;;  %v766_v61 = vadd.f32 %v732_v57, %v731_v56  ;;  %v733_v0 = vmax.f32 %v663_v58, 0.0  ;;  %v720_v57 = vpop.f32.mrf.mxu1  ;;  %v530_v59 = vpop.permute.xlu1 %529 }
  0xf6   : > { %v668_v63 = vpop.f32.mrf.mxu0 }
  0xf7   : > { %v734_v1 = vmax.f32 %v665_v60, 0.0  ;;  %v669_v2 = vadd.f32 %v668_v63, %v485_v62  ;;  %767 = vadd.xlane.f32.xlu0 %v766_v61 }
  0xf8   : > { %v670_v3 = vpop.f32.mrf.mxu0 }
  0xf9   : > { %v671_v4 = vadd.f32 %v670_v3, %v485_v62  ;;  %v769_v5 = vadd.f32 %v734_v1, %v733_v0  ;;  %v735_v8 = vmax.f32 %v669_v2, 0.0  ;;  %v535_v0 = vpop.permute.xlu0 %534  ;;  %v722_v3 = vpop.f32.mrf.mxu1 }
  0xfa   : > { %v672_v7 = vpop.f32.mrf.mxu0 }
  0xfb   : > { %v736_v9 = vmax.f32 %v671_v4, 0.0  ;;  %v673_v10 = vadd.f32 %v672_v7, %v490_v6  ;;  %770 = vadd.xlane.f32.xlu1 %v769_v5 }
  0xfc   : > { %v674_v11 = vpop.f32.mrf.mxu0 }
  0xfd   : > { %v675_v13 = vadd.f32 %v674_v11, %v490_v6  ;;  %v772_v14 = vadd.f32 %v736_v9, %v735_v8  ;;  %v737_v16 = vmax.f32 %v673_v10, 0.0  ;;  %v719_v8 = vadd.f32 %v718_v48, %v535_v0 }
  0xfe   : > { %v678_v15 = vpop.f32.mrf.mxu0  ;;  %v721_v9 = vadd.f32 %v720_v57, %v535_v0  ;;  %v393_v11 = vlaneseq }
  0xff   : > { %v738_v17 = vmax.f32 %v675_v13, 0.0  ;;  %v679_v18 = vadd.f32 %v678_v15, %v495_v12  ;;  %773 = vadd.xlane.f32.xlu0 %v772_v14  ;;  %v724_v15 = vpop.f32.mrf.mxu1 }
 0x100   : > { %v680_v19 = vpop.f32.mrf.mxu0 }
 0x101   : > { %v681_v21 = vadd.f32 %v680_v19, %v495_v12  ;;  %v775_v22 = vadd.f32 %v738_v17, %v737_v16  ;;  %v739_v25 = vmax.f32 %v679_v18, 0.0  ;;  %v540_v12 = vpop.permute.xlu1 %539 }
 0x102   : > { %v682_v23 = vpop.f32.mrf.mxu0 }
 0x103   : > { %v740_v26 = vmax.f32 %v681_v21, 0.0  ;;  %v683_v27 = vadd.f32 %v682_v23, %v500_v20  ;;  %776 = vadd.xlane.f32.xlu1 %v775_v22  ;;  %v756_v21 = vmax.f32 %v721_v9, 0.0  ;;  %v3086_v23 = vshrl.u32 %v393_v11, 7 }
 0x104   : > { %v684_v28 = vpop.f32.mrf.mxu0 }
 0x105   : > { %v685_v29 = vadd.f32 %v684_v28, %v500_v20  ;;  %v778_v30 = vadd.f32 %v740_v26, %v739_v25  ;;  %v741_v33 = vmax.f32 %v683_v27, 0.0  ;;  %v755_v20 = vmax.f32 %v719_v8, 0.0 }
 0x106   : > { %v688_v31 = vpop.f32.mrf.mxu0  ;;  %v725_v25 = vadd.f32 %v724_v15, %v540_v12  ;;  %v3125_v57 = vsub.s32 5, %v3086_v23 }
 0x107   : > { %v742_v34 = vmax.f32 %v685_v29, 0.0  ;;  %v689_v35 = vadd.f32 %v688_v31, %v505_v24  ;;  %779 = vadd.xlane.f32.xlu0 %v778_v30  ;;  %v2871_v30 = vmov 1966171168  }
 0x108   : > { %v690_v36 = vpop.f32.mrf.mxu0  ;;  %v412_v31 = vunpack.c.l.s4 %v2871_v30 }
 0x109   : > { %v691_v38 = vadd.f32 %v690_v36, %v505_v24  ;;  %v781_v39 = vadd.f32 %v742_v34, %v741_v33  ;;  %v743_v41 = vmax.f32 %v689_v35, 0.0  ;;  %v723_v24 = vadd.f32 %v722_v3, %v540_v12 }
 0x10a   : > { %v692_v40 = vpop.f32.mrf.mxu0  ;;  %v3092_v33 = vsub.s32 1, %v3086_v23  ;;  %v3095_v34 = vsub.s32 2, %v3086_v23  ;;  %v3098_v35 = vsub.s32 3, %v3086_v23 }
 0x10b   : > { %v744_v42 = vmax.f32 %v691_v38, 0.0  ;;  %v693_v43 = vadd.f32 %v692_v40, %v510_v32  ;;  %782 = vadd.xlane.f32.xlu1 %v781_v39  ;;  %v757_v36 = vmax.f32 %v723_v24, 0.0  ;;  %v802_v39 = vadd.f32 %v756_v21, %v755_v20  ;;  %v391_v40 = vpop.xlane.xlu0 %390 }
 0x10c   : > { %v694_v44 = vpop.f32.mrf.mxu0 }
 0x10d   : > { %v695_v46 = vadd.f32 %v694_v44, %v510_v32  ;;  %v784_v47 = vadd.f32 %v744_v42, %v743_v41  ;;  %v745_v51 = vmax.f32 %v693_v43, 0.0  ;;  %v3089_v32 = vsub.s32 0, %v3086_v23 }
 0x10e   : > { %v698_v49 = vpop.f32.mrf.mxu0  ;;  %v413_v42 = vunpack.c.0.s8 %v412_v31  ;;  %v400_v44 = vrot.slane %v391_v40, %v3092_v33 }
 0x10f   : > { %v746_v52 = vmax.f32 %v695_v46, 0.0  ;;  %v699_v53 = vadd.f32 %v698_v49, %v515_v37  ;;  %785 = vadd.xlane.f32.xlu0 %v784_v47  ;;  %v396_v41 = vrot.slane %v391_v40, %v3089_v32  ;;  %v408_v46 = vrot.slane %v391_v40, %v3098_v35 }
 0x110   : > { %v700_v54 = vpop.f32.mrf.mxu0  ;;  %v3105_v49 = vsub.s32 %v413_v42, %v3086_v23 }
 0x111   : > { %v701_v55 = vadd.f32 %v700_v54, %v515_v37  ;;  %v787_v56 = vadd.f32 %v746_v52, %v745_v51  ;;  %v747_v60 = vmax.f32 %v699_v53, 0.0  ;;  %v758_v37 = vmax.f32 %v725_v25, 0.0 }
 0x112   : > { %v702_v58 = vpop.f32.mrf.mxu0  ;;  %v409_v47 = vcombine.low %v396_v41, %v400_v44  ;;  %v2872_v54 = vmov 0.0  }
 0x113   : > { %v748_v61 = vmax.f32 %v701_v55, 0.0  ;;  %v703_v62 = vadd.f32 %v702_v58, %v520_v45  ;;  %788 = vadd.xlane.f32.xlu1 %v787_v56  ;;  %v805_v43 = vadd.f32 %v758_v37, %v757_v36  ;;  %347 = vst.msk [vmem:[#allocation2] sm:$0x1] %vm346_vm3, %v2872_v54  ;;  %348 = vst [vmem:[#allocation3] sm:$0x1] %v2872_v54  ;;  %2645 = vmatprep.subr.mxu1 %v2872_v54 }
 0x114   : > { %v704_v63 = vpop.f32.mrf.mxu0  ;;  %v2299_v55 = vld [vmem:[%s3585_s1] sm:$0xf]  ;;  %2647 = vmatprep.mubr.msk.f32.mxu1 %vm2873_vm4, %v2872_v54  ;;  %v3122_v56 = vsub.s32 4, %v3086_v23  ;;  %v3128_v58 = vsub.s32 6, %v3086_v23 }
 0x115   : > { %v705_v1 = vadd.f32 %v704_v63, %v520_v45  ;;  %v790_v2 = vadd.f32 %v748_v61, %v747_v60  ;;  %v749_v5 = vmax.f32 %v703_v62, 0.0  ;;  %v404_v45 = vrot.slane %v391_v40, %v3095_v34  ;;  %2646 = vmatpush3.msk.msra.mxu1 %vm386_vm2, %v2299_v55 }
 0x116   : > { %v708_v4 = vpop.f32.mrf.mxu0  ;;  %2650 = vmatprep.subr.mxu1 %v2872_v54  ;;  %v3134_v61 = vand.u32 127, %v393_v11  ;;  %vm2268_vm2 = vcmask 982912  }
 0x117   : > { %v750_v6 = vmax.f32 %v705_v1, 0.0  ;;  %v709_v7 = vadd.f32 %v708_v4, %v525_v50  ;;  %791 = vadd.xlane.f32.xlu0 %v790_v2  ;;  %v410_v48 = vcombine.low %v404_v45, %v408_v46 }
 0x118   : > { %v710_v10 = vpop.f32.mrf.mxu0  ;;  %v3146_v11 = vsub.s32 %v3134_v61, %v3086_v23 }
 0x119   : > { %v711_v13 = vadd.f32 %v710_v10, %v525_v50  ;;  %v793_v14 = vadd.f32 %v750_v6, %v749_v5  ;;  %v751_v17 = vmax.f32 %v709_v7, 0.0  ;;  %v417_v50 = vrot.slane %v409_v47, %v3105_v49 }
 0x11a   : > { %v712_v16 = vpop.f32.mrf.mxu0  ;;  %v424_v51 = vrot.slane %v410_v48, %v3105_v49 }
 0x11b   : > { %v752_v18 = vmax.f32 %v711_v13, 0.0  ;;  %v713_v19 = vadd.f32 %v712_v16, %v530_v59  ;;  %794 = vadd.xlane.f32.xlu1 %v793_v14 }
 0x11c   : > { %v714_v22 = vpop.f32.mrf.mxu0  ;;  %v425_v52 = vcombine.low %v417_v50, %v424_v51 }
 0x11d   : > { %v715_v26 = vadd.f32 %v714_v22, %v530_v59  ;;  %v796_v27 = vadd.f32 %v752_v18, %v751_v17  ;;  %v753_v28 = vmax.f32 %v713_v19, 0.0  ;;  %v3131_v59 = vsub.s32 7, %v3086_v23 }
 0x11e   : > { %v432_v53 = vrot.slane %v425_v52, %v3105_v49 }
 0x11f   : > { %v754_v29 = vmax.f32 %v715_v26, 0.0  ;;  %797 = vadd.xlane.f32.xlu0 %v796_v27 }
 0x121   : > { %v799_v38 = vadd.f32 %v754_v29, %v753_v28 }
 0x123   : > { %800 = vadd.xlane.f32.xlu1 %v799_v38  ;;  %803 = vadd.xlane.f32.xlu0 %v802_v39 }
 0x127   : > { %806 = vadd.xlane.f32.xlu1 %v805_v43 }
 0x139   : > { %434 = vperm.xlu0 %2751, %v432_v53  }
 0x178   : > { %v762_v60 = vpop.xlane.xlu1 %761 }
 0x179   : > { %v827_v62 = vrot.slane %v762_v60, %v3089_v32  ;;  %v831_v63 = vrot.slane %v762_v60, %v3092_v33  ;;  %v835_v0 = vrot.slane %v762_v60, %v3095_v34  ;;  %v839_v1 = vrot.slane %v762_v60, %v3098_v35 }
 0x17a   : > { %v843_v2 = vrot.slane %v762_v60, %v3122_v56  ;;  %v847_v3 = vrot.slane %v762_v60, %v3125_v57  ;;  %v851_v4 = vrot.slane %v762_v60, %v3128_v58  ;;  %v855_v5 = vrot.slane %v762_v60, %v3131_v59 }
 0x17b   : > { %v1336_v6 = vcombine.low %v827_v62, %v831_v63  ;;  %v1337_v7 = vcombine.low %v835_v0, %v839_v1 }
 0x17c   : > { %v765_v8 = vpop.xlane.xlu0 %764  ;;  %v1338_v9 = vcombine.low %v843_v2, %v847_v3  ;;  %v1339_v10 = vcombine.low %v851_v4, %v855_v5 }
 0x17d   : > { %v1346_v12 = vrot.slane %v1336_v6, %v3105_v49  ;;  %v1353_v13 = vrot.slane %v1337_v7, %v3105_v49  ;;  %v859_v14 = vrot.slane %v765_v8, %v3089_v32  ;;  %v863_v15 = vrot.slane %v765_v8, %v3092_v33 }
 0x17e   : > { %v1360_v16 = vrot.slane %v1338_v9, %v3105_v49  ;;  %v1367_v17 = vrot.slane %v1339_v10, %v3105_v49  ;;  %v867_v18 = vrot.slane %v765_v8, %v3095_v34  ;;  %v871_v19 = vrot.slane %v765_v8, %v3098_v35 }
 0x17f   : > { %v1368_v20 = vcombine.low %v1346_v12, %v1353_v13  ;;  %v875_v21 = vrot.slane %v765_v8, %v3122_v56  ;;  %v879_v22 = vrot.slane %v765_v8, %v3125_v57  ;;  %v883_v24 = vrot.slane %v765_v8, %v3128_v58 }
 0x180   : > { %v768_v25 = vpop.xlane.xlu0 %767  ;;  %v1369_v26 = vcombine.low %v1360_v16, %v1367_v17  ;;  %v887_v27 = vrot.slane %v765_v8, %v3131_v59  ;;  %v1385_v28 = vcombine.low %v859_v14, %v863_v15  ;;  %v1386_v29 = vcombine.low %v867_v18, %v871_v19 }
 0x181   : > { %v1376_v30 = vrot.slane %v1368_v20, %v3105_v49  ;;  %v1387_v31 = vcombine.low %v875_v21, %v879_v22  ;;  %v891_v36 = vrot.slane %v768_v25, %v3089_v32  ;;  %v895_v37 = vrot.slane %v768_v25, %v3092_v33 }
 0x182   : > { %v1383_v38 = vrot.slane %v1369_v26, %v3105_v49  ;;  %v1388_v39 = vcombine.low %v883_v24, %v887_v27  ;;  %v1395_v40 = vrot.slane %v1385_v28, %v3105_v49  ;;  %v1402_v41 = vrot.slane %v1386_v29, %v3105_v49 }
 0x183   : > { %v1409_v42 = vrot.slane %v1387_v31, %v3105_v49  ;;  %v899_v43 = vrot.slane %v768_v25, %v3095_v34  ;;  %v903_v44 = vrot.slane %v768_v25, %v3098_v35  ;;  %v907_v45 = vrot.slane %v768_v25, %v3122_v56 }
 0x184   : > { %v771_v46 = vpop.xlane.xlu1 %770  ;;  %v1384_v47 = vcombine.low %v1376_v30, %v1383_v38  ;;  %v1416_v48 = vrot.slane %v1388_v39, %v3105_v49  ;;  %v1417_v50 = vcombine.low %v1395_v40, %v1402_v41  ;;  %v911_v51 = vrot.slane %v768_v25, %v3125_v57 }
 0x185   : > { %v915_v52 = vrot.slane %v768_v25, %v3128_v58  ;;  %v919_v53 = vrot.slane %v768_v25, %v3131_v59  ;;  %v1434_v55 = vcombine.low %v891_v36, %v895_v37  ;;  %v1435_v60 = vcombine.low %v899_v43, %v903_v44 }
 0x186   : > { %2121 = vperm.xlu1 %2752, %v1384_v47   ;;  %v1418_v62 = vcombine.low %v1409_v42, %v1416_v48  ;;  %v1425_v63 = vrot.slane %v1417_v50, %v3105_v49  ;;  %v1436_v0 = vcombine.low %v907_v45, %v911_v51  ;;  %v923_v1 = vrot.slane %v771_v46, %v3089_v32 }
 0x187   : > { %v1437_v2 = vcombine.low %v915_v52, %v919_v53  ;;  %v1444_v3 = vrot.slane %v1434_v55, %v3105_v49  ;;  %v1451_v4 = vrot.slane %v1435_v60, %v3105_v49  ;;  %v927_v5 = vrot.slane %v771_v46, %v3092_v33 }
 0x188   : > { %v1432_v6 = vrot.slane %v1418_v62, %v3105_v49  ;;  %v1458_v7 = vrot.slane %v1436_v0, %v3105_v49  ;;  %v931_v8 = vrot.slane %v771_v46, %v3095_v34  ;;  %v935_v9 = vrot.slane %v771_v46, %v3098_v35  ;;  %v774_v10 = vpop.xlane.xlu0 %773 }
 0x189   : > { %v1465_v12 = vrot.slane %v1437_v2, %v3105_v49  ;;  %v1466_v13 = vcombine.low %v1444_v3, %v1451_v4  ;;  %v939_v14 = vrot.slane %v771_v46, %v3122_v56  ;;  %v943_v15 = vrot.slane %v771_v46, %v3125_v57 }
 0x18a   : > { %v1433_v16 = vcombine.low %v1425_v63, %v1432_v6  ;;  %v947_v17 = vrot.slane %v771_v46, %v3128_v58  ;;  %v951_v18 = vrot.slane %v771_v46, %v3131_v59  ;;  %v1483_v19 = vcombine.low %v923_v1, %v927_v5 }
 0x18b   : > { %v1467_v20 = vcombine.low %v1458_v7, %v1465_v12  ;;  %v1474_v21 = vrot.slane %v1466_v13, %v3105_v49  ;;  %v1484_v22 = vcombine.low %v931_v8, %v935_v9  ;;  %v1485_v24 = vcombine.low %v939_v14, %v943_v15 }
 0x18c   : > { %2124 = vperm.xlu1 %2752, %v1433_v16   ;;  %v1486_v25 = vcombine.low %v947_v17, %v951_v18  ;;  %v1493_v26 = vrot.slane %v1483_v19, %v3105_v49  ;;  %v955_v27 = vrot.slane %v774_v10, %v3089_v32  ;;  %v959_v28 = vrot.slane %v774_v10, %v3092_v33  ;;  %v777_v37 = vpop.xlane.xlu1 %776 }
 0x18d   : > { %v1481_v29 = vrot.slane %v1467_v20, %v3105_v49  ;;  %v1500_v30 = vrot.slane %v1484_v22, %v3105_v49  ;;  %v1507_v31 = vrot.slane %v1485_v24, %v3105_v49  ;;  %v963_v36 = vrot.slane %v774_v10, %v3095_v34 }
 0x18e   : > { %v1514_v38 = vrot.slane %v1486_v25, %v3105_v49  ;;  %v967_v39 = vrot.slane %v774_v10, %v3098_v35  ;;  %v971_v40 = vrot.slane %v774_v10, %v3122_v56  ;;  %v975_v41 = vrot.slane %v774_v10, %v3125_v57 }
 0x18f   : > { %v1482_v42 = vcombine.low %v1474_v21, %v1481_v29  ;;  %v1515_v43 = vcombine.low %v1493_v26, %v1500_v30  ;;  %v979_v44 = vrot.slane %v774_v10, %v3128_v58  ;;  %v983_v45 = vrot.slane %v774_v10, %v3131_v59 }
 0x190   : > { %v1516_v46 = vcombine.low %v1507_v31, %v1514_v38  ;;  %v1532_v47 = vcombine.low %v955_v27, %v959_v28  ;;  %v1533_v48 = vcombine.low %v963_v36, %v967_v39  ;;  %v1534_v50 = vcombine.low %v971_v40, %v975_v41  ;;  %v780_v1 = vpop.xlane.xlu0 %779 }
 0x191   : > { %2127 = vperm.xlu0 %2751, %v1482_v42   ;;  %v1523_v51 = vrot.slane %v1515_v43, %v3105_v49  ;;  %v1535_v52 = vcombine.low %v979_v44, %v983_v45  ;;  %v987_v53 = vrot.slane %v777_v37, %v3089_v32  ;;  %v991_v55 = vrot.slane %v777_v37, %v3092_v33 }
 0x192   : > { %v1530_v60 = vrot.slane %v1516_v46, %v3105_v49  ;;  %v1542_v62 = vrot.slane %v1532_v47, %v3105_v49  ;;  %v1549_v63 = vrot.slane %v1533_v48, %v3105_v49  ;;  %v1556_v0 = vrot.slane %v1534_v50, %v3105_v49 }
 0x193   : > { %v1563_v2 = vrot.slane %v1535_v52, %v3105_v49  ;;  %v995_v3 = vrot.slane %v777_v37, %v3095_v34  ;;  %v999_v4 = vrot.slane %v777_v37, %v3098_v35  ;;  %v1003_v5 = vrot.slane %v777_v37, %v3122_v56 }
 0x194   : > { %v1531_v6 = vcombine.low %v1523_v51, %v1530_v60  ;;  %v1564_v7 = vcombine.low %v1542_v62, %v1549_v63  ;;  %v1007_v8 = vrot.slane %v777_v37, %v3125_v57  ;;  %v1011_v9 = vrot.slane %v777_v37, %v3128_v58  ;;  %v783_v24 = vpop.xlane.xlu1 %782 }
 0x195   : > { %v1565_v10 = vcombine.low %v1556_v0, %v1563_v2  ;;  %v1015_v12 = vrot.slane %v777_v37, %v3131_v59  ;;  %v1581_v13 = vcombine.low %v987_v53, %v991_v55  ;;  %v1582_v14 = vcombine.low %v995_v3, %v999_v4 }
 0x196   : > { %2130 = vperm.xlu1 %2752, %v1531_v6   ;;  %v1572_v15 = vrot.slane %v1564_v7, %v3105_v49  ;;  %v1583_v16 = vcombine.low %v1003_v5, %v1007_v8  ;;  %v1019_v17 = vrot.slane %v780_v1, %v3089_v32  ;;  %v1023_v18 = vrot.slane %v780_v1, %v3092_v33 }
 0x197   : > { %v1579_v19 = vrot.slane %v1565_v10, %v3105_v49  ;;  %v1584_v20 = vcombine.low %v1011_v9, %v1015_v12  ;;  %v1591_v21 = vrot.slane %v1581_v13, %v3105_v49  ;;  %v1598_v22 = vrot.slane %v1582_v14, %v3105_v49 }
 0x198   : > { %v1605_v25 = vrot.slane %v1583_v16, %v3105_v49  ;;  %v1027_v26 = vrot.slane %v780_v1, %v3095_v34  ;;  %v1031_v27 = vrot.slane %v780_v1, %v3098_v35  ;;  %v1035_v28 = vrot.slane %v780_v1, %v3122_v56  ;;  %v786_v55 = vpop.xlane.xlu0 %785 }
 0x199   : > { %v1580_v29 = vcombine.low %v1572_v15, %v1579_v19  ;;  %v1612_v30 = vrot.slane %v1584_v20, %v3105_v49  ;;  %v1613_v31 = vcombine.low %v1591_v21, %v1598_v22  ;;  %v1039_v36 = vrot.slane %v780_v1, %v3125_v57 }
 0x19a   : > { %v1043_v37 = vrot.slane %v780_v1, %v3128_v58  ;;  %v1047_v38 = vrot.slane %v780_v1, %v3131_v59  ;;  %v1630_v39 = vcombine.low %v1019_v17, %v1023_v18  ;;  %v1631_v40 = vcombine.low %v1027_v26, %v1031_v27 }
 0x19b   : > { %2133 = vperm.xlu0 %2751, %v1580_v29   ;;  %v1614_v41 = vcombine.low %v1605_v25, %v1612_v30  ;;  %v1621_v42 = vrot.slane %v1613_v31, %v3105_v49  ;;  %v1632_v43 = vcombine.low %v1035_v28, %v1039_v36  ;;  %v1051_v44 = vrot.slane %v783_v24, %v3089_v32 }
 0x19c   : > { %v1633_v45 = vcombine.low %v1043_v37, %v1047_v38  ;;  %v1640_v46 = vrot.slane %v1630_v39, %v3105_v49  ;;  %v1647_v47 = vrot.slane %v1631_v40, %v3105_v49  ;;  %v1055_v48 = vrot.slane %v783_v24, %v3092_v33  ;;  %v789_v18 = vpop.xlane.xlu1 %788 }
 0x19d   : > { %v1628_v50 = vrot.slane %v1614_v41, %v3105_v49  ;;  %v1654_v51 = vrot.slane %v1632_v43, %v3105_v49  ;;  %v1059_v52 = vrot.slane %v783_v24, %v3095_v34  ;;  %v1063_v53 = vrot.slane %v783_v24, %v3098_v35 }
 0x19e   : > { %v1661_v60 = vrot.slane %v1633_v45, %v3105_v49  ;;  %v1662_v62 = vcombine.low %v1640_v46, %v1647_v47  ;;  %v1067_v63 = vrot.slane %v783_v24, %v3122_v56  ;;  %v1071_v0 = vrot.slane %v783_v24, %v3125_v57 }
 0x19f   : > { %v1629_v1 = vcombine.low %v1621_v42, %v1628_v50  ;;  %v1075_v2 = vrot.slane %v783_v24, %v3128_v58  ;;  %v1079_v3 = vrot.slane %v783_v24, %v3131_v59  ;;  %v1679_v4 = vcombine.low %v1051_v44, %v1055_v48 }
 0x1a0   : > { %v1663_v5 = vcombine.low %v1654_v51, %v1661_v60  ;;  %v1670_v6 = vrot.slane %v1662_v62, %v3105_v49  ;;  %v1680_v7 = vcombine.low %v1059_v52, %v1063_v53  ;;  %v1681_v8 = vcombine.low %v1067_v63, %v1071_v0  ;;  %v792_v36 = vpop.xlane.xlu0 %791 }
 0x1a1   : > { %2136 = vperm.xlu1 %2752, %v1629_v1   ;;  %v1682_v9 = vcombine.low %v1075_v2, %v1079_v3  ;;  %v1689_v10 = vrot.slane %v1679_v4, %v3105_v49  ;;  %v1083_v12 = vrot.slane %v786_v55, %v3089_v32  ;;  %v1087_v13 = vrot.slane %v786_v55, %v3092_v33 }
 0x1a2   : > { %v1677_v14 = vrot.slane %v1663_v5, %v3105_v49  ;;  %v1696_v15 = vrot.slane %v1680_v7, %v3105_v49  ;;  %v1703_v16 = vrot.slane %v1681_v8, %v3105_v49  ;;  %v1091_v17 = vrot.slane %v786_v55, %v3095_v34 }
 0x1a3   : > { %v1710_v19 = vrot.slane %v1682_v9, %v3105_v49  ;;  %v1095_v20 = vrot.slane %v786_v55, %v3098_v35  ;;  %v1099_v21 = vrot.slane %v786_v55, %v3122_v56  ;;  %v1103_v22 = vrot.slane %v786_v55, %v3125_v57 }
 0x1a4   : > { %v1678_v24 = vcombine.low %v1670_v6, %v1677_v14  ;;  %v1711_v25 = vcombine.low %v1689_v10, %v1696_v15  ;;  %v1107_v26 = vrot.slane %v786_v55, %v3128_v58  ;;  %v1111_v27 = vrot.slane %v786_v55, %v3131_v59  ;;  %v795_v9 = vpop.xlane.xlu1 %794 }
 0x1a5   : > { %v1712_v28 = vcombine.low %v1703_v16, %v1710_v19  ;;  %v1728_v29 = vcombine.low %v1083_v12, %v1087_v13  ;;  %v1729_v30 = vcombine.low %v1091_v17, %v1095_v20  ;;  %v1730_v31 = vcombine.low %v1099_v21, %v1103_v22 }
 0x1a6   : > { %2139 = vperm.xlu0 %2751, %v1678_v24   ;;  %v1719_v37 = vrot.slane %v1711_v25, %v3105_v49  ;;  %v1731_v38 = vcombine.low %v1107_v26, %v1111_v27  ;;  %v1115_v39 = vrot.slane %v789_v18, %v3089_v32  ;;  %v1119_v40 = vrot.slane %v789_v18, %v3092_v33 }
 0x1a7   : > { %v1726_v41 = vrot.slane %v1712_v28, %v3105_v49  ;;  %v1738_v42 = vrot.slane %v1728_v29, %v3105_v49  ;;  %v1745_v43 = vrot.slane %v1729_v30, %v3105_v49  ;;  %v1752_v44 = vrot.slane %v1730_v31, %v3105_v49 }
 0x1a8   : > { %v1759_v45 = vrot.slane %v1731_v38, %v3105_v49  ;;  %v1123_v46 = vrot.slane %v789_v18, %v3095_v34  ;;  %v1127_v47 = vrot.slane %v789_v18, %v3098_v35  ;;  %v1131_v48 = vrot.slane %v789_v18, %v3122_v56  ;;  %v3271_v60 = vpop.xlane.xlu0 %797 }
 0x1a9   : > { %v1727_v50 = vcombine.low %v1719_v37, %v1726_v41  ;;  %v1760_v51 = vcombine.low %v1738_v42, %v1745_v43  ;;  %v1135_v52 = vrot.slane %v789_v18, %v3125_v57  ;;  %v1139_v53 = vrot.slane %v789_v18, %v3128_v58 }
 0x1aa   : > { %v1761_v55 = vcombine.low %v1752_v44, %v1759_v45  ;;  %v1143_v62 = vrot.slane %v789_v18, %v3131_v59  ;;  %v1777_v63 = vcombine.low %v1115_v39, %v1119_v40  ;;  %v1778_v0 = vcombine.low %v1123_v46, %v1127_v47 }
 0x1ab   : > { %2142 = vperm.xlu1 %2752, %v1727_v50   ;;  %v1768_v1 = vrot.slane %v1760_v51, %v3105_v49  ;;  %v1779_v2 = vcombine.low %v1131_v48, %v1135_v52  ;;  %v1147_v3 = vrot.slane %v792_v36, %v3089_v32  ;;  %v1151_v4 = vrot.slane %v792_v36, %v3092_v33 }
 0x1ac   : > { %v1775_v5 = vrot.slane %v1761_v55, %v3105_v49  ;;  %v1780_v6 = vcombine.low %v1139_v53, %v1143_v62  ;;  %v1787_v7 = vrot.slane %v1777_v63, %v3105_v49  ;;  %v1794_v8 = vrot.slane %v1778_v0, %v3105_v49  ;;  %v3289_v26 = vpop.xlane.xlu0 %803 }
 0x1ad   : > { %v1801_v10 = vrot.slane %v1779_v2, %v3105_v49  ;;  %v1155_v12 = vrot.slane %v792_v36, %v3095_v34  ;;  %v1159_v13 = vrot.slane %v792_v36, %v3098_v35  ;;  %v1163_v14 = vrot.slane %v792_v36, %v3122_v56 }
 0x1ae   : > { %v1776_v15 = vcombine.low %v1768_v1, %v1775_v5  ;;  %v1808_v16 = vrot.slane %v1780_v6, %v3105_v49  ;;  %v1809_v17 = vcombine.low %v1787_v7, %v1794_v8  ;;  %v1167_v18 = vrot.slane %v792_v36, %v3125_v57 }
 0x1af   : > { %v1171_v19 = vrot.slane %v792_v36, %v3128_v58  ;;  %v1175_v20 = vrot.slane %v792_v36, %v3131_v59  ;;  %v1826_v21 = vcombine.low %v1147_v3, %v1151_v4  ;;  %v1827_v22 = vcombine.low %v1155_v12, %v1159_v13 }
 0x1b0   : > { %2145 = vperm.xlu0 %2751, %v1776_v15   ;;  %v1810_v24 = vcombine.low %v1801_v10, %v1808_v16  ;;  %v1817_v25 = vrot.slane %v1809_v17, %v3105_v49  ;;  %v1828_v27 = vcombine.low %v1163_v14, %v1167_v18  ;;  %v1179_v28 = vrot.slane %v795_v9, %v3089_v32  ;;  %v801_v10 = vpop.xlane.xlu1 %800  ;;  %v382_v14 = vld [vmem:[#allocation2] sm:$0x1] }
 0x1b1   : > { %v1829_v29 = vcombine.low %v1171_v19, %v1175_v20  ;;  %v1836_v30 = vrot.slane %v1826_v21, %v3105_v49  ;;  %v1843_v31 = vrot.slane %v1827_v22, %v3105_v49  ;;  %v1183_v37 = vrot.slane %v795_v9, %v3092_v33 }
 0x1b2   : > { %v1824_v36 = vrot.slane %v1810_v24, %v3105_v49  ;;  %v1850_v38 = vrot.slane %v1828_v27, %v3105_v49  ;;  %v1187_v39 = vrot.slane %v795_v9, %v3095_v34  ;;  %v1191_v40 = vrot.slane %v795_v9, %v3098_v35 }
 0x1b3   : > { %v1857_v41 = vrot.slane %v1829_v29, %v3105_v49  ;;  %v1858_v42 = vcombine.low %v1836_v30, %v1843_v31  ;;  %v1195_v43 = vrot.slane %v795_v9, %v3122_v56  ;;  %v1199_v44 = vrot.slane %v795_v9, %v3125_v57 }
 0x1b4   : > { %v1825_v45 = vcombine.low %v1817_v25, %v1824_v36  ;;  %v1203_v46 = vrot.slane %v795_v9, %v3128_v58  ;;  %v1207_v47 = vrot.slane %v795_v9, %v3131_v59  ;;  %v1875_v48 = vcombine.low %v1179_v28, %v1183_v37  ;;  %v435_v50 = vpop.permute.xlu0 %434 }
 0x1b5   : > { %v1859_v51 = vcombine.low %v1850_v38, %v1857_v41  ;;  %v1866_v52 = vrot.slane %v1858_v42, %v3105_v49  ;;  %v1876_v53 = vcombine.low %v1187_v39, %v1191_v40  ;;  %v1877_v55 = vcombine.low %v1195_v43, %v1199_v44 }
 0x1b6   : > { %2148 = vperm.xlu1 %2752, %v1825_v45   ;;  %v1878_v62 = vcombine.low %v1203_v46, %v1207_v47  ;;  %v1885_v63 = vrot.slane %v1875_v48, %v3105_v49  ;;  %v441_v0 = vrot.slane %v435_v50, %v3146_v11  ;;  %v1211_v1 = vrot.slane %v3271_v60, %v3089_v32 }
 0x1b7   : > { %v1873_v2 = vrot.slane %v1859_v51, %v3105_v49  ;;  %v1892_v3 = vrot.slane %v1876_v53, %v3105_v49  ;;  %v1899_v4 = vrot.slane %v1877_v55, %v3105_v49  ;;  %v1215_v5 = vrot.slane %v3271_v60, %v3092_v33 }
 0x1b8   : > { %v1906_v6 = vrot.slane %v1878_v62, %v3105_v49  ;;  %v448_v7 = vrot.slane %v441_v0, %v3105_v49  ;;  %v1219_v8 = vrot.slane %v3271_v60, %v3095_v34  ;;  %v1223_v9 = vrot.slane %v3271_v60, %v3098_v35 }
 0x1b9   : > { %v1874_v12 = vcombine.low %v1866_v52, %v1873_v2  ;;  %v1907_v13 = vcombine.low %v1885_v63, %v1892_v3  ;;  %v1227_v15 = vrot.slane %v3271_v60, %v3122_v56  ;;  %v1231_v16 = vrot.slane %v3271_v60, %v3125_v57  ;;  %v807_v2 = vpop.xlane.xlu1 %806 }
 0x1ba   : > { %v1908_v17 = vcombine.low %v1899_v4, %v1906_v6  ;;  %v455_v18 = vrot.slane %v448_v7, %v3105_v49  ;;  %v1235_v19 = vrot.slane %v3271_v60, %v3128_v58  ;;  %v1239_v20 = vrot.slane %v3271_v60, %v3131_v59 }
 0x1bb   : > { %2151 = vperm.xlu0 %2751, %v1874_v12   ;;  %v1915_v21 = vrot.slane %v1907_v13, %v3105_v49  ;;  %v1924_v22 = vcombine.low %v1211_v1, %v1215_v5  ;;  %v1925_v24 = vcombine.low %v1219_v8, %v1223_v9  ;;  %v1926_v25 = vcombine.low %v1227_v15, %v1231_v16 }
 0x1bc   : > { %v1922_v27 = vrot.slane %v1908_v17, %v3105_v49  ;;  %v457_v28 = vadd.f32 %v455_v18, %v382_v14  ;;  %v1927_v29 = vcombine.low %v1235_v19, %v1239_v20  ;;  %v1243_v30 = vrot.slane %v801_v10, %v3089_v32 }
 0x1bd   : > { %v1934_v31 = vrot.slane %v1924_v22, %v3105_v49  ;;  %v1941_v37 = vrot.slane %v1925_v24, %v3105_v49  ;;  %v1948_v36 = vrot.slane %v1926_v25, %v3105_v49  ;;  %v1247_v60 = vrot.slane %v801_v10, %v3092_v33 }
 0x1be   : > { %v1923_v38 = vcombine.low %v1915_v21, %v1922_v27  ;;  %459 = vst.msk [vmem:[#allocation2] sm:$0x1] %vm346_vm3, %v457_v28  ;;  %v1955_v39 = vrot.slane %v1927_v29, %v3105_v49  ;;  %v1251_v40 = vrot.slane %v801_v10, %v3095_v34  ;;  %v1255_v41 = vrot.slane %v801_v10, %v3098_v35 }
 0x1bf   : > { %v1956_v42 = vcombine.low %v1934_v31, %v1941_v37  ;;  %v1259_v43 = vrot.slane %v801_v10, %v3122_v56  ;;  %v1263_v44 = vrot.slane %v801_v10, %v3125_v57  ;;  %v1267_v45 = vrot.slane %v801_v10, %v3128_v58 }
 0x1c0   : > { %2154 = vperm.xlu1 %2752, %v1923_v38   ;;  %v1957_v46 = vcombine.low %v1948_v36, %v1955_v39  ;;  %v1271_v47 = vrot.slane %v801_v10, %v3131_v59  ;;  %v1973_v48 = vcombine.low %v1243_v30, %v1247_v60  ;;  %v1974_v50 = vcombine.low %v1251_v40, %v1255_v41 }
 0x1c1   : > { %v1964_v51 = vrot.slane %v1956_v42, %v3105_v49  ;;  %v1975_v52 = vcombine.low %v1259_v43, %v1263_v44  ;;  %v1275_v53 = vrot.slane %v3289_v26, %v3089_v32  ;;  %v1279_v55 = vrot.slane %v3289_v26, %v3092_v33 }
 0x1c2   : > { %v1971_v62 = vrot.slane %v1957_v46, %v3105_v49  ;;  %v1976_v63 = vcombine.low %v1267_v45, %v1271_v47  ;;  %v1983_v0 = vrot.slane %v1973_v48, %v3105_v49  ;;  %v1990_v1 = vrot.slane %v1974_v50, %v3105_v49  ;;  %v2394_v45 = vld [vmem:[%s3575_s5 + $0x70] sm:$0xff]  ;;  %v2393_v50 = vld [vmem:[%s3575_s5 + $0x68] sm:$0xff] }
 0x1c3   : > { %v1997_v3 = vrot.slane %v1975_v52, %v3105_v49  ;;  %v1283_v4 = vrot.slane %v3289_v26, %v3095_v34  ;;  %v1287_v5 = vrot.slane %v3289_v26, %v3098_v35  ;;  %v1291_v6 = vrot.slane %v3289_v26, %v3122_v56 }
 0x1c4   : > { %v1972_v7 = vcombine.low %v1964_v51, %v1971_v62  ;;  %v2004_v8 = vrot.slane %v1976_v63, %v3105_v49  ;;  %v2005_v9 = vcombine.low %v1983_v0, %v1990_v1  ;;  %v1295_v10 = vrot.slane %v3289_v26, %v3125_v57  ;;  %v2391_v62 = vld [vmem:[%s3575_s5 + $0x58] sm:$0xff]  ;;  %v2390_v63 = vld [vmem:[%s3575_s5 + $0x50] sm:$0xff]  ;;  %v2389_v0 = vld [vmem:[%s3575_s5 + $0x48] sm:$0xff] }
 0x1c5   : > { %v1299_v12 = vrot.slane %v3289_v26, %v3128_v58  ;;  %v1303_v13 = vrot.slane %v3289_v26, %v3131_v59  ;;  %v2022_v14 = vcombine.low %v1275_v53, %v1279_v55  ;;  %v2023_v15 = vcombine.low %v1283_v4, %v1287_v5  ;;  %v2297_v37 = vld [vmem:[#allocation2] sm:$0x1]  ;;  %v2385_v4 = vld [vmem:[%s3575_s5 + $0x28] sm:$0xff] }
 0x1c6   : > { %2157 = vperm.xlu0 %2751, %v1972_v7   ;;  %v2006_v16 = vcombine.low %v1997_v3, %v2004_v8  ;;  %v2013_v17 = vrot.slane %v2005_v9, %v3105_v49  ;;  %v2024_v18 = vcombine.low %v1291_v6, %v1295_v10  ;;  %v1307_v19 = vrot.slane %v807_v2, %v3089_v32  ;;  %v2392_v53 = vld [vmem:[%s3575_s5 + $0x60] sm:$0xff]  ;;  %v2386_v3 = vld [vmem:[%s3575_s5 + $0x30] sm:$0xff]  ;;  %v2383_v6 = vld [vmem:[%s3575_s5 + $0x18] sm:$0xff] }
 0x1c7   : > { %v2025_v20 = vcombine.low %v1299_v12, %v1303_v13  ;;  %v2032_v21 = vrot.slane %v2022_v14, %v3105_v49  ;;  %v2039_v22 = vrot.slane %v2023_v15, %v3105_v49  ;;  %v1311_v24 = vrot.slane %v807_v2, %v3092_v33  ;;  %v2388_v1 = vld [vmem:[%s3575_s5 + $0x40] sm:$0xff]  ;;  %v2382_v7 = vld [vmem:[%s3575_s5 + $0x10] sm:$0xff]  ;;  %v2381_v8 = vld [vmem:[%s3575_s5 + $0x8] sm:$0xff] }
 0x1c8   : > { %v2020_v25 = vrot.slane %v2006_v16, %v3105_v49  ;;  %v2046_v26 = vrot.slane %v2024_v18, %v3105_v49  ;;  %v1315_v27 = vrot.slane %v807_v2, %v3095_v34  ;;  %v1319_v28 = vrot.slane %v807_v2, %v3098_v35  ;;  %v2384_v5 = vld [vmem:[%s3575_s5 + $0x20] sm:$0xff] }
 0x1c9   : > { %v2053_v29 = vrot.slane %v2025_v20, %v3105_v49  ;;  %v2054_v30 = vcombine.low %v2032_v21, %v2039_v22  ;;  %v1323_v32 = vrot.slane %v807_v2, %v3122_v56  ;;  %v1327_v31 = vrot.slane %v807_v2, %v3125_v57  ;;  %v2395_v56 = vld [vmem:[%s3575_s5 + $0x78] sm:$0xff]  ;;  %v2380_v9 = vld [vmem:[%s3575_s5] sm:$0xff] }
 0x1ca   : > { %v2021_v36 = vcombine.low %v2013_v17, %v2020_v25  ;;  %v1331_v60 = vrot.slane %v807_v2, %v3128_v58  ;;  %v1335_v33 = vrot.slane %v807_v2, %v3131_v59  ;;  %v2071_v38 = vcombine.low %v1307_v19, %v1311_v24  ;;  %v2387_v2 = vld [vmem:[%s3575_s5 + $0x38] sm:$0xff] }
 0x1cb   : > { %v2055_v39 = vcombine.low %v2046_v26, %v2053_v29  ;;  %v2062_v40 = vrot.slane %v2054_v30, %v3105_v49  ;;  %v2072_v34 = vcombine.low %v1315_v27, %v1319_v28  ;;  %v2073_v41 = vcombine.low %v1323_v32, %v1327_v31 }
 0x1cc   : > { %2160 = vperm.xlu1 %2752, %v2021_v36   ;;  %v2074_v35 = vcombine.low %v1331_v60, %v1335_v33  ;;  %v2081_v42 = vrot.slane %v2071_v38, %v3105_v49  ;;  %v2298_v43 = vmul.f32 0.00390625, %v2297_v37  ;;  %v2172_v16 = vadd.s32 4294967288, %v3134_v61 }
 0x1cd   : > { %v2069_v57 = vrot.slane %v2055_v39, %v3105_v49  ;;  %v2088_v58 = vrot.slane %v2072_v34, %v3105_v49  ;;  %v2095_v59 = vrot.slane %v2073_v41, %v3105_v49  ;;  %v2179_v17 = vadd.s32 4294967280, %v3134_v61 }
 0x1ce   : > { %v2102_v44 = vrot.slane %v2074_v35, %v3105_v49  ;;  %2648 = vmatmul.mubr.msk.f32.vlgmr.msra.gmra.mxu1 %vm582_vm1, %v2298_v43  ;;  %v2186_v19 = vadd.s32 4294967272, %v3134_v61  ;;  %v2193_v21 = vadd.s32 4294967264, %v3134_v61  ;;  %v2175_v22 = vsub.s32 %v2172_v16, %v3086_v23 }
 0x1cf   : > { %v2070_v46 = vcombine.low %v2062_v40, %v2069_v57  ;;  %v2103_v47 = vcombine.low %v2081_v42, %v2088_v58  ;;  %2651 = vmatpush3.msra.mxu1 %v2395_v56  ;;  %2682 = vmatprep.mubr.msk.f32.mxu1 %vm2873_vm4, %v2872_v54  ;;  %v2182_v24 = vsub.s32 %v2179_v17, %v3086_v23  ;;  %v2207_v25 = vadd.s32 4294967248, %v3134_v61 }
 0x1d0   : > { %v2104_v48 = vcombine.low %v2095_v59, %v2102_v44  ;;  %2652 = vmatprep.subr.mxu1 %v2872_v54  ;;  %v2189_v27 = vsub.s32 %v2186_v19, %v3086_v23  ;;  %v2214_v28 = vadd.s32 4294967240, %v3134_v61  ;;  %v2196_v30 = vsub.s32 %v2193_v21, %v3086_v23 }
 0x1d1   : > { %2163 = vperm.xlu0 %2751, %v2070_v46   ;;  %v2111_v51 = vrot.slane %v2103_v47, %v3105_v49  ;;  %2653 = vmatpush3.msra.mxu1 %v2394_v45  ;;  %v2221_v32 = vadd.s32 4294967232, %v3134_v61  ;;  %v2228_v36 = vadd.s32 4294967224, %v3134_v61  ;;  %v2210_v33 = vsub.s32 %v2207_v25, %v3086_v23 }
 0x1d2   : > { %v2118_v52 = vrot.slane %v2104_v48, %v3105_v49  ;;  %2654 = vmatprep.subr.mxu1 %v2872_v54  ;;  %v2235_v39 = vadd.s32 4294967216, %v3134_v61  ;;  %v2217_v41 = vsub.s32 %v2214_v28, %v3086_v23  ;;  %v2242_v42 = vadd.s32 4294967208, %v3134_v61 }
 0x1d3   : > { %2655 = vmatpush3.msra.mxu1 %v2393_v50  ;;  %v2224_v56 = vsub.s32 %v2221_v32, %v3086_v23  ;;  %v2249_v57 = vadd.s32 4294967200, %v3134_v61  ;;  %v2231_v44 = vsub.s32 %v2228_v36, %v3086_v23  ;;  %v2256_v45 = vadd.s32 4294967192, %v3134_v61  ;;  %v2300_v32 = vld [vmem:[%s3572_s2] sm:$0x1] }
 0x1d4   : > { %v2119_v55 = vcombine.low %v2111_v51, %v2118_v52  ;;  %2656 = vmatprep.subr.mxu1 %v2872_v54  ;;  %v2238_v47 = vsub.s32 %v2235_v39, %v3086_v23  ;;  %v2245_v52 = vsub.s32 %v2242_v42, %v3086_v23  ;;  %vm2261_vm1 = vcmask 917312  }
 0x1d5   : > { %2657 = vmatpush3.msra.mxu1 %v2392_v53  ;;  %vm2275_vm3 = vcmask 1048512  }
 0x1d6   : > { %2166 = vperm.xlu1 %2752, %v2119_v55   ;;  %2658 = vmatprep.subr.mxu1 %v2872_v54 }
 0x1d7   : > { %2659 = vmatpush3.msra.mxu1 %v2391_v62 }
 0x1d8   : > { %2660 = vmatprep.subr.mxu1 %v2872_v54 }
 0x1d9   : > { %2661 = vmatpush3.msra.mxu1 %v2390_v63  ;;  %v2252_v63 = vsub.s32 %v2249_v57, %v3086_v23 }
 0x1da   : > { %2662 = vmatprep.subr.mxu1 %v2872_v54 }
 0x1db   : > { %2663 = vmatpush3.msra.mxu1 %v2389_v0  ;;  %v2263_v0 = vadd.s32 4294967184, %v3134_v61 }
 0x1dc   : > { %2664 = vmatprep.subr.mxu1 %v2872_v54 }
 0x1dd   : > { %2665 = vmatpush3.msra.mxu1 %v2388_v1 }
 0x1de   : > { %2666 = vmatprep.subr.mxu1 %v2872_v54 }
 0x1df   : > { %2667 = vmatpush3.msra.mxu1 %v2387_v2 }
 0x1e0   : > { %2668 = vmatprep.subr.mxu1 %v2872_v54 }
 0x1e1   : > { %2669 = vmatpush3.msra.mxu1 %v2386_v3  ;;  %v2259_v3 = vsub.s32 %v2256_v45, %v3086_v23 }
 0x1e2   : > { %2670 = vmatprep.subr.mxu1 %v2872_v54 }
 0x1e3   : > { %2671 = vmatpush3.msra.mxu1 %v2385_v4 }
 0x1e4   : > { %2672 = vmatprep.subr.mxu1 %v2872_v54 }
 0x1e5   : > { %2673 = vmatpush3.msra.mxu1 %v2384_v5 }
 0x1e6   : > { %2674 = vmatprep.subr.mxu1 %v2872_v54 }
 0x1e7   : > { %2675 = vmatpush3.msra.mxu1 %v2383_v6 }
 0x1e8   : > { %2676 = vmatprep.subr.mxu1 %v2872_v54 }
 0x1e9   : > { %2677 = vmatpush3.msra.mxu1 %v2382_v7 }
 0x1ea   : > { %2678 = vmatprep.subr.mxu1 %v2872_v54 }
 0x1eb   : > { %2679 = vmatpush3.msra.mxu1 %v2381_v8 }
 0x1ec   : > { %2680 = vmatprep.subr.mxu1 %v2872_v54  ;;  %v2200_v54 = vadd.s32 4294967256, %v3134_v61 }
 0x1ed   : > { %2681 = vmatpush3.msra.mxu1 %v2380_v9  ;;  %v2270_v9 = vadd.s32 4294967176, %v3134_v61 }
 0x1ee   : > { %v2203_v37 = vsub.s32 %v2200_v54, %v3086_v23 }
 0x1ef   : > { %v2273_v19 = vsub.s32 %v2270_v9, %v3086_v23 }
 0x201   : > { %v2122_v10 = vpop.permute.xlu1 %2121 }
 0x202   : > { %v2171_v40 = vrot.slane %v2122_v10, %v3146_v11 }
 0x207   : > { %v2125_v12 = vpop.permute.xlu1 %2124 }
 0x208   : > { %v2176_v31 = vrot.slane %v2125_v12, %v2175_v22 }
 0x20a   : > { %v2178_v58 = vsel %vm2177_vm5, %v2176_v31, %v2171_v40 }
 0x20c   : > { %v2128_v13 = vpop.permute.xlu0 %2127 }
 0x20d   : > { %v2183_v60 = vrot.slane %v2128_v13, %v2182_v24  ;;  %v2266_v13 = vsub.s32 %v2263_v0, %v3086_v23 }
 0x20f   : > { %v2185_v11 = vsel %vm2184_vm6, %v2183_v60, %v2178_v58 }
 0x211   : > { %v2131_v14 = vpop.permute.xlu1 %2130 }
 0x212   : > { %v2190_v34 = vrot.slane %v2131_v14, %v2189_v27  ;;  %v759_v27 = vld [vmem:[#allocation3] sm:$0x1] }
 0x214   : > { %v2192_v50 = vsel %vm2191_vm7, %v2190_v34, %v2185_v11 }
 0x216   : > { %v2134_v15 = vpop.permute.xlu0 %2133 }
 0x217   : > { %v2197_v43 = vrot.slane %v2134_v15, %v2196_v30 }
 0x219   : > { %v2199_v55 = vsel %vm2198_vm8, %v2197_v43, %v2192_v50 }
 0x21c   : > { %v2137_v18 = vpop.permute.xlu1 %2136 }
 0x21d   : > { %v2204_v59 = vrot.slane %v2137_v18, %v2203_v37 }
 0x21f   : > { %v2206_v1 = vsel %vm2205_vm9, %v2204_v59, %v2199_v55 }
 0x221   : > { %v2140_v20 = vpop.permute.xlu0 %2139 }
 0x222   : > { %v2211_v46 = vrot.slane %v2140_v20, %v2210_v33 }
 0x224   : > { %v2213_v4 = vsel %vm2212_vm10, %v2211_v46, %v2206_v1 }
 0x226   : > { %v2143_v26 = vpop.permute.xlu1 %2142 }
 0x227   : > { %v2218_v51 = vrot.slane %v2143_v26, %v2217_v41 }
 0x229   : > { %v2220_v7 = vsel %vm2219_vm11, %v2218_v51, %v2213_v4 }
 0x22b   : > { %v2146_v29 = vpop.permute.xlu0 %2145 }
 0x22c   : > { %v2225_v62 = vrot.slane %v2146_v29, %v2224_v56 }
 0x22e   : > { %v2227_v10 = vsel %vm2226_vm12, %v2225_v62, %v2220_v7 }
 0x231   : > { %v2149_v38 = vpop.permute.xlu1 %2148 }
 0x232   : > { %v2232_v2 = vrot.slane %v2149_v38, %v2231_v44 }
 0x234   : > { %v2234_v14 = vsel %vm2233_vm13, %v2232_v2, %v2227_v10 }
 0x236   : > { %v2152_v35 = vpop.permute.xlu0 %2151 }
 0x237   : > { %v2239_v5 = vrot.slane %v2152_v35, %v2238_v47 }
 0x239   : > { %v2241_v17 = vsel %vm2240_vm14, %v2239_v5, %v2234_v14 }
 0x23b   : > { %v2155_v48 = vpop.permute.xlu1 %2154 }
 0x23c   : > { %v2246_v8 = vrot.slane %v2155_v48, %v2245_v52 }
 0x23e   : > { %v2248_v18 = vsel %vm2247_vm15, %v2246_v8, %v2241_v17 }
 0x241   : > { %v2158_v53 = vpop.permute.xlu0 %2157 }
 0x242   : > { %v2253_v12 = vrot.slane %v2158_v53, %v2252_v63 }
 0x244   : > { %v2255_v20 = vsel %vm2254_vm0, %v2253_v12, %v2248_v18 }
 0x247   : > { %v2161_v6 = vpop.permute.xlu1 %2160 }
 0x248   : > { %v2260_v15 = vrot.slane %v2161_v6, %v2259_v3 }
 0x24a   : > { %v2262_v22 = vsel %vm2261_vm1, %v2260_v15, %v2255_v20 }
 0x24c   : > { %v2164_v16 = vpop.permute.xlu0 %2163 }
 0x24d   : > { %v2267_v21 = vrot.slane %v2164_v16, %v2266_v13 }
 0x24f   : > { %v2269_v24 = vsel %vm2268_vm2, %v2267_v21, %v2262_v22 }
 0x251   : > { %v2167_v61 = vpop.permute.xlu1 %2166 }
 0x252   : > { %v2274_v54 = vrot.slane %v2167_v61, %v2273_v19 }
 0x254   : > { %v2276_v25 = vsel %vm2275_vm3, %v2274_v54, %v2269_v24 }
 0x255   : > { %v2283_v26 = vrot.slane %v2276_v25, %v3105_v49 }
 0x257   : > { %v2290_v28 = vrot.slane %v2283_v26, %v3105_v49 }
 0x259   : > { %v2292_v29 = vadd.f32 %v2290_v28, %v759_v27 }
 0x25b   : > { %2293 = vst [vmem:[#allocation3] sm:$0x1] %v2292_v29 }
 0x262   : > { %v2378_v23 = vld [vmem:[#allocation3] sm:$0x1] }
 0x263   : > { %v2379_v30 = vmul.f32 0.00390625, %v2378_v23 }
 0x265   : > { %2683 = vmatmul.mubr.f32.vlgmr.msra.gmra.mxu1 %v2379_v30 }
 0x28e   : > { %v2373_v31 = vpop.f32.mrf.mxu1 }
 0x28f   : > { %v2374_v37 = vadd.f32 %v2373_v31, %v2300_v32 }
 0x290   : > { %v2649_v36 = vpop.f32.mrf.mxu1 }
 0x291   : > { %2377 = vst [vmem:[%s324_s25] sm:$0x1] %v2374_v37 }
 0x292   : > { %2775 = shalt.err (!%p2772_p5)
}
 0x293   : > { %s2776_s25 = scalar_lea.hbm %s2483_s16, 16  ;;  %s2780_s26 = scalar_lea.hbm %s3577_s7, 32 }
 0x294   : > { %p2777_p6 = scmp.ne.s32.totalorder %s2483_s16, %s2776_s25  ;;  %p2781_p10 = scmp.lt.s32.totalorder %s2483_s16, %s3577_s7 }
 0x295   : > { %p2782_p11 = scmp.lt.s32.totalorder %s2780_s26, %s2776_s25 }
 0x296   : > { %p2778_p7 = pnand %p2777_p6, %p2961_p4 }
 0x297   : > { %p2783_p12 = por %p2782_p11, %p2781_p10 }
 0x298   : > { %p2779_p9 = pneg %p2778_p7 }
 0x29a   : > { %p2784_p13 = pnand %p2783_p12, %p2779_p9 }
 0x29c   : > { %2787 = shalt.err (!%p2784_p13)
}
 0x29d   : > { %2687 = dma.vmem_to_hbm [thread:$0]  (%p2961_p4), %s2486_s11, 16, %s2483_s16, %s2469_s19   ;;  %v2396_v49 = vld [vmem:[%s3576_s6] sm:$0x1] }
 0x29e   : > { %s330_s23 = scalar_lea.vmem [#allocation6], %s3495_s22  ;;  %s3586_s0 = sshll.u32 %s2860_s30, 4 }
 0x29f   : > { %s2498_s24 = sshll.u32 %s330_s23, 4  ;;  %s3529_s25 = scalar_lea.hbm %s3578_s8, %s3586_s0  ;;  %s2499_s24 = int_to_ptr.vmem [resolvable:$true] %s2498_s24 }
 0x2a0   : > { %s2473_s12 = scalar_lea.sflag [#allocation7], %s3495_s22  ;;  %s2788_s14 = scalar_lea.vmem %s2499_s24, 16 }
 0x2a1   : > { %p2789_p0 = scmp.ne.s32.totalorder %s2499_s24, %s2788_s14  ;;  %s2875_s11 = smov [#allocation6]  }
 0x2a2   : > { %s2792_s16 = sshll.u32 %s2875_s11, 4  ;;  %s2793_s16 = int_to_ptr.vmem [resolvable:$false] %s2792_s16 }
 0x2a3   : > { %p2790_p1 = pnand %p2789_p0, %p2961_p4  ;;  %s2794_s19 = scalar_lea.vmem %s2793_s16, 32 }
 0x2a4   : > { %p2795_p3 = scmp.lt.s32.totalorder %s2499_s24, %s2793_s16  ;;  %p2796_p5 = scmp.lt.s32.totalorder %s2794_s19, %s2788_s14 }
 0x2a5   : > { %p2791_p2 = pneg %p2790_p1 }
 0x2a6   : > { %p2797_p6 = por %p2796_p5, %p2795_p3 }
 0x2a8   : > { %p2798_p7 = pnand %p2797_p6, %p2791_p2 }
 0x325   : > { %v2463_v60 = vpop.f32.mrf.mxu1 }
 0x326   : > { %v2464_v33 = vadd.f32 %v2463_v60, %v2396_v49 }
 0x327   : > { %v2684_v38 = vpop.f32.mrf.mxu1 }
 0x328   : > { %2467 = vst [vmem:[%s330_s23] sm:$0x1] %v2464_v33 }
 0x329   : > { %2801 = shalt.err (!%p2798_p7)
}
 0x32a   : > { %s2802_s30 = scalar_lea.hbm %s3529_s25, 16  ;;  %s2806_s21 = scalar_lea.hbm %s3578_s8, 32 }
 0x32b   : > { %p2803_p9 = scmp.ne.s32.totalorder %s3529_s25, %s2802_s30  ;;  %p2807_p12 = scmp.lt.s32.totalorder %s3529_s25, %s3578_s8 }
 0x32c   : > { %p2808_p13 = scmp.lt.s32.totalorder %s2806_s21, %s2802_s30 }
 0x32d   : > { %p2804_p10 = pnand %p2803_p9, %p2961_p4 }
 0x32e   : > { %p2809_p0 = por %p2808_p13, %p2807_p12 }
 0x32f   : > { %p2805_p11 = pneg %p2804_p10 }
 0x331   : > { %p2810_p1 = pnand %p2809_p0, %p2805_p11 }
 0x333   : > { %2813 = shalt.err (!%p2810_p1)
}
 0x334   : > { %2688 = dma.vmem_to_hbm [thread:$0]  (%p2961_p4), %s2499_s24, 16, %s3529_s25, %s2473_s12  }
 0x335 PF: > { %p2698_p2 = scmp.ge.s32.totalorder %s2868_s10, 2  ;;  %s2510_s1 = sand.u32 1, %s2848_s27  }
 0x336   : > { %s2511_s26 = scalar_lea.sflag [#allocation5], %s2510_s1 }
 0x337   : > { %p2692_p3 = pnand %p2698_p2, %p2968_p8 }
 0x339   : > { %p2693_p5 = pneg %p2692_p3 }
 0x33b   : > { %2839 = dma.done.wait (%p2693_p5), %s2511_s26, 16  }
 0x33c   : > { %2841 = vsyncadd (%p2693_p5), %s2511_s26, 4294967280  ;;  %s2519_s14 = scalar_lea.sflag [#allocation7], %s2510_s1 }
 0x33d   : > { %2843 = dma.done.wait (%p2693_p5), %s2519_s14, 16  }
 0x33e   : > { %2845 = vsyncadd (%p2693_p5), %s2519_s14, 4294967280  ;;  %s25_s10 = sadd.s32 1, %s2868_s10   ;;  %s3587_s27 = smov %s2852_s28 }
 0x33f   : > { %p22_p6 = scmp.ge.s32.totalorder %s25_s10, 4   ;;  %s3588_s28 = smov %s2856_s29 }
 0x340   : > { %s3589_s29 = smov %s2974_s18  ;;  %s3590_s30 = smov %s2864_s9 }
 0x341   : > { %s3591_s9 = smov %s3593_s13  ;;  %24 = sbr.rel (!%p22_p6) target bundleno = 9 (0x9), region = 108 }
 0x346   :  { %2523 = vsyncpa [#allocation5], 1 }
 0x347   :  { %2525 = vsyncpa [#allocation5 + $0x1], 1 }
 0x348   :  { %2526 = vsyncpa [#allocation7], 1 }
 0x349   :  { %2528 = vsyncpa [#allocation7 + $0x1], 1 }

</bundles_post_ra>
